<compile_context>
chip_gen: v7x
topology: tpu7x:2x2x1
jax: 0.10.0
libtpu: 0.0.40
codegen_flags: <defaults>
</compile_context>

<pallas_src>
import math

import jax
import jax.numpy as jnp
from jax import lax
from jax.experimental import pallas as pl
from jax.experimental.pallas import tpu as pltpu

INPUT_DIM = 101
HIDDEN = 32
FC_DIM = 128
OUT_DIM = 3


def myrnn_kernel(x_ref,                                   # (T*B, INPUT_DIM), time-major rows
                 wih1_ref, whh1_ref, bgi1_ref, bhn1_ref,  # GRU layer 1
                 wih2_ref, whh2_ref, bgi2_ref, bhn2_ref,  # GRU layer 2
                 w1_ref, b1_ref, w2_ref, b2_ref,          # fc1, fc2
                 wo_ref, bo_ref,                          # out
                 out_ref,                                 # (B, OUT_DIM)
                 hidden_ref):                             # (B, H)
    B, H = hidden_ref.shape
    T = x_ref.shape[0] // B

    # Load weights once; hoist all broadcasts out of the unrolled loops.
    whh1 = whh1_ref[...]
    whh2 = whh2_ref[...]
    wih2 = wih2_ref[...]
    bhn1 = jnp.broadcast_to(bhn1_ref[...], (B, H))
    bhn2 = jnp.broadcast_to(bhn2_ref[...], (B, H))
    bgi2 = jnp.broadcast_to(bgi2_ref[...], (B, 3 * H))

    def gru_step(g_t, h, whh, bhn):
        # g_t already contains x@W_ih + b_ih (+ b_hh for the r/z gates).
        gh = jnp.dot(h, whh, preferred_element_type=jnp.float32)          # (B, 3H)
        rz = jax.nn.sigmoid(g_t[:, :2 * H] + gh[:, :2 * H])               # fused r,z (one EUP op)
        r = rz[:, :H]
        z = rz[:, H:]
        n = jnp.tanh(g_t[:, 2 * H:] + r * (gh[:, 2 * H:] + bhn))
        # (1-z)*n + z*h keeps the chain from n (the latest-arriving value) at 2 VPU ops.
        return (1.0 - z) * n + z * h

    # ---- Layer-1 input-side gates: one batched MXU matmul, off the serial chain ----
    gi1 = jnp.dot(x_ref[...], wih1_ref[...],
                  preferred_element_type=jnp.float32) + bgi1_ref[...]      # (T*B, 3H)

    # ---- GRU layer 1 (101 -> H), layer-2 input gates computed on the fly ----
    h1 = jnp.zeros((B, H), jnp.float32)
    gi2 = []
    for t in range(T):                           # fully unrolled; h1 stays in vregs
        h1 = gru_step(gi1[t * B:(t + 1) * B], h1, whh1, bhn1)
        # Depends only on h1_t -> hidden under layer-1's recurrence latency slack.
        gi2.append(jnp.dot(h1, wih2, preferred_element_type=jnp.float32) + bgi2)

    # ---- GRU layer 2 (H -> H), seeded with layer-1's FINAL hidden (PyTorch quirk) ----
    h2 = h1
    for t in range(T):
        h2 = gru_step(gi2[t], h2, whh2, bhn2)

    hidden_ref[...] = h2    # x[:, -1, :] of layer-2 output == its final hidden

    # ---- MLP head: relu(fc1) -> relu(fc2) -> out ----
    y = jnp.dot(h2, w1_ref[...], preferred_element_type=jnp.float32) + b1_ref[...]
    y = jnp.maximum(y, 0.0)
    y = jnp.dot(y, w2_ref[...], preferred_element_type=jnp.float32) + b2_ref[...]
    y = jnp.maximum(y, 0.0)
    out_ref[...] = jnp.dot(y, wo_ref[...], preferred_element_type=jnp.float32) + bo_ref[...]


def myrnn_forward(x, kernel_params):
    """x: (B, T, 101) float32, batch-first like PyTorch. Returns (logits, hidden)."""
    B, T, _ = x.shape
    H = HIDDEN
    # Time-major flatten so per-timestep rows are contiguous (row = t*B + b).
    x_flat = jnp.transpose(x, (1, 0, 2)).reshape(T * B, INPUT_DIM)

    vmem = pl.BlockSpec(memory_space=pltpu.MemorySpace.VMEM)
    # NOTE: for large B on v7x, add a batch-parallel grid axis
    # (dimension_semantics=("parallel",)) so both TensorCores get work; at
    # B=2 a gridless single-core call is optimal.
    out, hidden = pl.pallas_call(
        myrnn_kernel,
        out_shape=(jax.ShapeDtypeStruct((B, OUT_DIM), jnp.float32),
                   jax.ShapeDtypeStruct((B, H), jnp.float32)),
        in_specs=[vmem] * 15,
        out_specs=(vmem, vmem),
    )(x_flat, *kernel_params)
    return out, hidden[None]  # hidden -> (1, B, H) like PyTorch


def init_raw_params(key):
    """Raw synthetic parameters in PyTorch layouts (weight (out,in), bias (out,))."""
    keys = jax.random.split(key, 14)
    kh = 1.0 / math.sqrt(HIDDEN)
    kf1 = 1.0 / math.sqrt(HIDDEN)
    kf2 = 1.0 / math.sqrt(FC_DIM)

    def u(k, shape, bound):
        return jax.random.uniform(k, shape, jnp.float32, -bound, bound)

    return dict(
        w_ih1=u(keys[0], (3 * HIDDEN, INPUT_DIM), kh),
        w_hh1=u(keys[1], (3 * HIDDEN, HIDDEN), kh),
        b_ih1=u(keys[2], (3 * HIDDEN,), kh),
        b_hh1=u(keys[3], (3 * HIDDEN,), kh),
        w_ih2=u(keys[4], (3 * HIDDEN, HIDDEN), kh),
        w_hh2=u(keys[5], (3 * HIDDEN, HIDDEN), kh),
        b_ih2=u(keys[6], (3 * HIDDEN,), kh),
        b_hh2=u(keys[7], (3 * HIDDEN,), kh),
        w1=u(keys[8], (FC_DIM, HIDDEN), kf1),
        b1=u(keys[9], (FC_DIM,), kf1),
        w2=u(keys[10], (FC_DIM, FC_DIM), kf2),
        b2=u(keys[11], (FC_DIM,), kf2),
        wo=u(keys[12], (OUT_DIM, FC_DIM), kf2),
        bo=u(keys[13], (OUT_DIM,), kf2),
    )


def prep_kernel_params(p):
    """Transpose to right-matmul layouts and fold biases for the kernel."""
    H = HIDDEN

    def gru(w_ih, w_hh, b_ih, b_hh):
        wih = w_ih.T                                   # (in, 3H)
        whh = w_hh.T                                   # (H, 3H)
        # r/z gates: b_ih + b_hh folded into the precomputed gi; the n gate
        # keeps b_hn separate because PyTorch applies it inside r * (W_hn h + b_hn).
        b_gi = (b_ih + jnp.concatenate(
            [b_hh[:2 * H], jnp.zeros((H,), jnp.float32)]))[None]   # (1, 3H)
        b_hn = b_hh[2 * H:][None]                                   # (1, H)
        return wih, whh, b_gi, b_hn

    g1 = gru(p["w_ih1"], p["w_hh1"], p["b_ih1"], p["b_hh1"])
    g2 = gru(p["w_ih2"], p["w_hh2"], p["b_ih2"], p["b_hh2"])
    head = (p["w1"].T, p["b1"][None], p["w2"].T, p["b2"][None],
            p["wo"].T, p["bo"][None])
    return (*g1, *g2, *head)


def myrnn_reference(x, p):
    """Pure-JAX reference (lax.scan) on the raw PyTorch-layout params."""
    B = x.shape[0]
    H = HIDDEN
    x_tbd = jnp.transpose(x, (1, 0, 2))

    def gru_scan(seq_tbd, h0, w_ih, w_hh, b_ih, b_hh):
        def step(h, x_t):
            gi = x_t @ w_ih.T + b_ih
            gh = h @ w_hh.T + b_hh
            r = jax.nn.sigmoid(gi[:, :H] + gh[:, :H])
            z = jax.nn.sigmoid(gi[:, H:2 * H] + gh[:, H:2 * H])
            n = jnp.tanh(gi[:, 2 * H:] + r * gh[:, 2 * H:])
            h_new = (1.0 - z) * n + z * h
            return h_new, h_new
        hf, seq = lax.scan(step, h0, seq_tbd)
        return seq, hf

    h0 = jnp.zeros((B, H), jnp.float32)
    seq1, h1f = gru_scan(x_tbd, h0, p["w_ih1"], p["w_hh1"], p["b_ih1"], p["b_hh1"])
    _, h2f = gru_scan(seq1, h1f, p["w_ih2"], p["w_hh2"], p["b_ih2"], p["b_hh2"])
    y = jnp.maximum(h2f @ p["w1"].T + p["b1"], 0.0)
    y = jnp.maximum(y @ p["w2"].T + p["b2"], 0.0)
    return y @ p["wo"].T + p["bo"], h2f[None]


if __name__ == "__main__":
    key = jax.random.PRNGKey(0)
    k_x, k_p = jax.random.split(key)

    B, T = 2, 8
    x = jax.random.normal(k_x, (B, T, INPUT_DIM), jnp.float32)
    raw = init_raw_params(k_p)
    kparams = prep_kernel_params(raw)

    out, hidden = jax.jit(myrnn_forward)(x, kparams)
    jax.block_until_ready((out, hidden))

    ref_out, ref_hidden = myrnn_reference(x, raw)
    assert out.shape == (B, OUT_DIM) and hidden.shape == (1, B, HIDDEN)
    assert jnp.allclose(out, ref_out, atol=1e-4, rtol=1e-4)
    assert jnp.allclose(hidden, ref_hidden, atol=1e-4, rtol=1e-4)

    print("KERNEL_OK")
</pallas_src>

<mosaic_0001>
module attributes {stable_mosaic.version = 11 : i64} {
  func.func @myrnn_kernel(%arg0: memref<16x101xf32, #tpu.memory_space<vmem>>, %arg1: memref<101x96xf32, #tpu.memory_space<vmem>>, %arg2: memref<32x96xf32, #tpu.memory_space<vmem>>, %arg3: memref<1x96xf32, #tpu.memory_space<vmem>>, %arg4: memref<1x32xf32, #tpu.memory_space<vmem>>, %arg5: memref<32x96xf32, #tpu.memory_space<vmem>>, %arg6: memref<32x96xf32, #tpu.memory_space<vmem>>, %arg7: memref<1x96xf32, #tpu.memory_space<vmem>>, %arg8: memref<1x32xf32, #tpu.memory_space<vmem>>, %arg9: memref<32x128xf32, #tpu.memory_space<vmem>>, %arg10: memref<1x128xf32, #tpu.memory_space<vmem>>, %arg11: memref<128x128xf32, #tpu.memory_space<vmem>>, %arg12: memref<1x128xf32, #tpu.memory_space<vmem>>, %arg13: memref<128x3xf32, #tpu.memory_space<vmem>>, %arg14: memref<1x3xf32, #tpu.memory_space<vmem>>, %arg15: memref<2x3xf32, #tpu.memory_space<vmem>>, %arg16: memref<2x32xf32, #tpu.memory_space<vmem>>) attributes {dimension_semantics = [], scalar_prefetch = 0 : i64, scratch_operands = 0 : i64, tpu.core_type = #tpu.core_type<tc>} {
    %c0 = arith.constant 0 : index
    %c0_0 = arith.constant 0 : index
    %0 = vector.load %arg2[%c0, %c0_0] : memref<32x96xf32, #tpu.memory_space<vmem>>, vector<32x96xf32>
    %c0_1 = arith.constant 0 : index
    %c0_2 = arith.constant 0 : index
    %1 = vector.load %arg6[%c0_1, %c0_2] : memref<32x96xf32, #tpu.memory_space<vmem>>, vector<32x96xf32>
    %c0_3 = arith.constant 0 : index
    %c0_4 = arith.constant 0 : index
    %2 = vector.load %arg5[%c0_3, %c0_4] : memref<32x96xf32, #tpu.memory_space<vmem>>, vector<32x96xf32>
    %c0_5 = arith.constant 0 : index
    %c0_6 = arith.constant 0 : index
    %3 = vector.load %arg4[%c0_5, %c0_6] : memref<1x32xf32, #tpu.memory_space<vmem>>, vector<1x32xf32>
    %4 = vector.shape_cast %3 : vector<1x32xf32> to vector<1x32xf32>
    %5 = vector.broadcast %4 : vector<1x32xf32> to vector<2x32xf32>
    %c0_7 = arith.constant 0 : index
    %c0_8 = arith.constant 0 : index
    %6 = vector.load %arg8[%c0_7, %c0_8] : memref<1x32xf32, #tpu.memory_space<vmem>>, vector<1x32xf32>
    %7 = vector.shape_cast %6 : vector<1x32xf32> to vector<1x32xf32>
    %8 = vector.broadcast %7 : vector<1x32xf32> to vector<2x32xf32>
    %c0_9 = arith.constant 0 : index
    %c0_10 = arith.constant 0 : index
    %9 = vector.load %arg7[%c0_9, %c0_10] : memref<1x96xf32, #tpu.memory_space<vmem>>, vector<1x96xf32>
    %10 = vector.shape_cast %9 : vector<1x96xf32> to vector<1x96xf32>
    %11 = vector.broadcast %10 : vector<1x96xf32> to vector<2x96xf32>
    %c0_11 = arith.constant 0 : index
    %c0_12 = arith.constant 0 : index
    %12 = vector.load %arg0[%c0_11, %c0_12] : memref<16x101xf32, #tpu.memory_space<vmem>>, vector<16x101xf32>
    %c0_13 = arith.constant 0 : index
    %c0_14 = arith.constant 0 : index
    %13 = vector.load %arg1[%c0_13, %c0_14] : memref<101x96xf32, #tpu.memory_space<vmem>>, vector<101x96xf32>
    %cst = arith.constant dense<0.000000e+00> : vector<16x96xf32>
    %14 = tpu.matmul %12, %13, %cst {dimension_numbers = #tpu.dot_dimension_numbers<[1], [0], [0], [1], [0, 0, 1, 1], [], []>} : vector<16x101xf32>, vector<101x96xf32>, vector<16x96xf32> -> vector<16x96xf32>
    %c0_15 = arith.constant 0 : index
    %c0_16 = arith.constant 0 : index
    %15 = vector.load %arg3[%c0_15, %c0_16] : memref<1x96xf32, #tpu.memory_space<vmem>>, vector<1x96xf32>
    %16 = vector.broadcast %15 : vector<1x96xf32> to vector<16x96xf32>
    %17 = arith.addf %14, %16 : vector<16x96xf32>
    %cst_17 = arith.constant 0.000000e+00 : f32
    %18 = vector.broadcast %cst_17 : f32 to vector<2x32xf32>
    %19 = vector.extract_strided_slice %17 {offsets = [0, 0], sizes = [2, 96], strides = [1, 1]} : vector<16x96xf32> to vector<2x96xf32>
    %cst_18 = arith.constant dense<0.000000e+00> : vector<2x96xf32>
    %20 = tpu.matmul %18, %0, %cst_18 {dimension_numbers = #tpu.dot_dimension_numbers<[1], [0], [0], [1], [0, 0, 1, 1], [], []>} : vector<2x32xf32>, vector<32x96xf32>, vector<2x96xf32> -> vector<2x96xf32>
    %21 = vector.extract_strided_slice %19 {offsets = [0, 0], sizes = [2, 64], strides = [1, 1]} : vector<2x96xf32> to vector<2x64xf32>
    %22 = vector.extract_strided_slice %20 {offsets = [0, 0], sizes = [2, 64], strides = [1, 1]} : vector<2x96xf32> to vector<2x64xf32>
    %23 = arith.addf %21, %22 : vector<2x64xf32>
    %24 = arith.negf %23 : vector<2x64xf32>
    %25 = math.exp %24 : vector<2x64xf32>
    %cst_19 = arith.constant 1.000000e+00 : f32
    %26 = vector.broadcast %cst_19 : f32 to vector<2x64xf32>
    %27 = arith.addf %26, %25 : vector<2x64xf32>
    %28 = arith.divf %26, %27 : vector<2x64xf32>
    %29 = vector.extract_strided_slice %28 {offsets = [0, 0], sizes = [2, 32], strides = [1, 1]} : vector<2x64xf32> to vector<2x32xf32>
    %30 = vector.extract_strided_slice %28 {offsets = [0, 32], sizes = [2, 32], strides = [1, 1]} : vector<2x64xf32> to vector<2x32xf32>
    %31 = vector.extract_strided_slice %19 {offsets = [0, 64], sizes = [2, 32], strides = [1, 1]} : vector<2x96xf32> to vector<2x32xf32>
    %32 = vector.extract_strided_slice %20 {offsets = [0, 64], sizes = [2, 32], strides = [1, 1]} : vector<2x96xf32> to vector<2x32xf32>
    %33 = arith.addf %32, %5 : vector<2x32xf32>
    %34 = arith.mulf %29, %33 : vector<2x32xf32>
    %35 = arith.addf %31, %34 : vector<2x32xf32>
    %36 = math.tanh %35 : vector<2x32xf32>
    %cst_20 = arith.constant 1.000000e+00 : f32
    %37 = vector.broadcast %cst_20 : f32 to vector<2x32xf32>
    %38 = arith.subf %37, %30 : vector<2x32xf32>
    %39 = arith.mulf %38, %36 : vector<2x32xf32>
    %40 = arith.mulf %30, %18 : vector<2x32xf32>
    %41 = arith.addf %39, %40 : vector<2x32xf32>
    %cst_21 = arith.constant dense<0.000000e+00> : vector<2x96xf32>
    %42 = tpu.matmul %41, %2, %cst_21 {dimension_numbers = #tpu.dot_dimension_numbers<[1], [0], [0], [1], [0, 0, 1, 1], [], []>} : vector<2x32xf32>, vector<32x96xf32>, vector<2x96xf32> -> vector<2x96xf32>
    %43 = arith.addf %42, %11 : vector<2x96xf32>
    %44 = vector.extract_strided_slice %17 {offsets = [2, 0], sizes = [2, 96], strides = [1, 1]} : vector<16x96xf32> to vector<2x96xf32>
    %cst_22 = arith.constant dense<0.000000e+00> : vector<2x96xf32>
    %45 = tpu.matmul %41, %0, %cst_22 {dimension_numbers = #tpu.dot_dimension_numbers<[1], [0], [0], [1], [0, 0, 1, 1], [], []>} : vector<2x32xf32>, vector<32x96xf32>, vector<2x96xf32> -> vector<2x96xf32>
    %46 = vector.extract_strided_slice %44 {offsets = [0, 0], sizes = [2, 64], strides = [1, 1]} : vector<2x96xf32> to vector<2x64xf32>
    %47 = vector.extract_strided_slice %45 {offsets = [0, 0], sizes = [2, 64], strides = [1, 1]} : vector<2x96xf32> to vector<2x64xf32>
    %48 = arith.addf %46, %47 : vector<2x64xf32>
    %49 = arith.negf %48 : vector<2x64xf32>
    %50 = math.exp %49 : vector<2x64xf32>
    %cst_23 = arith.constant 1.000000e+00 : f32
    %51 = vector.broadcast %cst_23 : f32 to vector<2x64xf32>
    %52 = arith.addf %51, %50 : vector<2x64xf32>
    %53 = arith.divf %51, %52 : vector<2x64xf32>
    %54 = vector.extract_strided_slice %53 {offsets = [0, 0], sizes = [2, 32], strides = [1, 1]} : vector<2x64xf32> to vector<2x32xf32>
    %55 = vector.extract_strided_slice %53 {offsets = [0, 32], sizes = [2, 32], strides = [1, 1]} : vector<2x64xf32> to vector<2x32xf32>
    %56 = vector.extract_strided_slice %44 {offsets = [0, 64], sizes = [2, 32], strides = [1, 1]} : vector<2x96xf32> to vector<2x32xf32>
    %57 = vector.extract_strided_slice %45 {offsets = [0, 64], sizes = [2, 32], strides = [1, 1]} : vector<2x96xf32> to vector<2x32xf32>
    %58 = arith.addf %57, %5 : vector<2x32xf32>
    %59 = arith.mulf %54, %58 : vector<2x32xf32>
    %60 = arith.addf %56, %59 : vector<2x32xf32>
    %61 = math.tanh %60 : vector<2x32xf32>
    %cst_24 = arith.constant 1.000000e+00 : f32
    %62 = vector.broadcast %cst_24 : f32 to vector<2x32xf32>
    %63 = arith.subf %62, %55 : vector<2x32xf32>
    %64 = arith.mulf %63, %61 : vector<2x32xf32>
    %65 = arith.mulf %55, %41 : vector<2x32xf32>
    %66 = arith.addf %64, %65 : vector<2x32xf32>
    %cst_25 = arith.constant dense<0.000000e+00> : vector<2x96xf32>
    %67 = tpu.matmul %66, %2, %cst_25 {dimension_numbers = #tpu.dot_dimension_numbers<[1], [0], [0], [1], [0, 0, 1, 1], [], []>} : vector<2x32xf32>, vector<32x96xf32>, vector<2x96xf32> -> vector<2x96xf32>
    %68 = arith.addf %67, %11 : vector<2x96xf32>
    %69 = vector.extract_strided_slice %17 {offsets = [4, 0], sizes = [2, 96], strides = [1, 1]} : vector<16x96xf32> to vector<2x96xf32>
    %cst_26 = arith.constant dense<0.000000e+00> : vector<2x96xf32>
    %70 = tpu.matmul %66, %0, %cst_26 {dimension_numbers = #tpu.dot_dimension_numbers<[1], [0], [0], [1], [0, 0, 1, 1], [], []>} : vector<2x32xf32>, vector<32x96xf32>, vector<2x96xf32> -> vector<2x96xf32>
    %71 = vector.extract_strided_slice %69 {offsets = [0, 0], sizes = [2, 64], strides = [1, 1]} : vector<2x96xf32> to vector<2x64xf32>
    %72 = vector.extract_strided_slice %70 {offsets = [0, 0], sizes = [2, 64], strides = [1, 1]} : vector<2x96xf32> to vector<2x64xf32>
    %73 = arith.addf %71, %72 : vector<2x64xf32>
    %74 = arith.negf %73 : vector<2x64xf32>
    %75 = math.exp %74 : vector<2x64xf32>
    %cst_27 = arith.constant 1.000000e+00 : f32
    %76 = vector.broadcast %cst_27 : f32 to vector<2x64xf32>
    %77 = arith.addf %76, %75 : vector<2x64xf32>
    %78 = arith.divf %76, %77 : vector<2x64xf32>
    %79 = vector.extract_strided_slice %78 {offsets = [0, 0], sizes = [2, 32], strides = [1, 1]} : vector<2x64xf32> to vector<2x32xf32>
    %80 = vector.extract_strided_slice %78 {offsets = [0, 32], sizes = [2, 32], strides = [1, 1]} : vector<2x64xf32> to vector<2x32xf32>
    %81 = vector.extract_strided_slice %69 {offsets = [0, 64], sizes = [2, 32], strides = [1, 1]} : vector<2x96xf32> to vector<2x32xf32>
    %82 = vector.extract_strided_slice %70 {offsets = [0, 64], sizes = [2, 32], strides = [1, 1]} : vector<2x96xf32> to vector<2x32xf32>
    %83 = arith.addf %82, %5 : vector<2x32xf32>
    %84 = arith.mulf %79, %83 : vector<2x32xf32>
    %85 = arith.addf %81, %84 : vector<2x32xf32>
    %86 = math.tanh %85 : vector<2x32xf32>
    %cst_28 = arith.constant 1.000000e+00 : f32
    %87 = vector.broadcast %cst_28 : f32 to vector<2x32xf32>
    %88 = arith.subf %87, %80 : vector<2x32xf32>
    %89 = arith.mulf %88, %86 : vector<2x32xf32>
    %90 = arith.mulf %80, %66 : vector<2x32xf32>
    %91 = arith.addf %89, %90 : vector<2x32xf32>
    %cst_29 = arith.constant dense<0.000000e+00> : vector<2x96xf32>
    %92 = tpu.matmul %91, %2, %cst_29 {dimension_numbers = #tpu.dot_dimension_numbers<[1], [0], [0], [1], [0, 0, 1, 1], [], []>} : vector<2x32xf32>, vector<32x96xf32>, vector<2x96xf32> -> vector<2x96xf32>
    %93 = arith.addf %92, %11 : vector<2x96xf32>
    %94 = vector.extract_strided_slice %17 {offsets = [6, 0], sizes = [2, 96], strides = [1, 1]} : vector<16x96xf32> to vector<2x96xf32>
    %cst_30 = arith.constant dense<0.000000e+00> : vector<2x96xf32>
    %95 = tpu.matmul %91, %0, %cst_30 {dimension_numbers = #tpu.dot_dimension_numbers<[1], [0], [0], [1], [0, 0, 1, 1], [], []>} : vector<2x32xf32>, vector<32x96xf32>, vector<2x96xf32> -> vector<2x96xf32>
    %96 = vector.extract_strided_slice %94 {offsets = [0, 0], sizes = [2, 64], strides = [1, 1]} : vector<2x96xf32> to vector<2x64xf32>
    %97 = vector.extract_strided_slice %95 {offsets = [0, 0], sizes = [2, 64], strides = [1, 1]} : vector<2x96xf32> to vector<2x64xf32>
    %98 = arith.addf %96, %97 : vector<2x64xf32>
    %99 = arith.negf %98 : vector<2x64xf32>
    %100 = math.exp %99 : vector<2x64xf32>
    %cst_31 = arith.constant 1.000000e+00 : f32
    %101 = vector.broadcast %cst_31 : f32 to vector<2x64xf32>
    %102 = arith.addf %101, %100 : vector<2x64xf32>
    %103 = arith.divf %101, %102 : vector<2x64xf32>
    %104 = vector.extract_strided_slice %103 {offsets = [0, 0], sizes = [2, 32], strides = [1, 1]} : vector<2x64xf32> to vector<2x32xf32>
    %105 = vector.extract_strided_slice %103 {offsets = [0, 32], sizes = [2, 32], strides = [1, 1]} : vector<2x64xf32> to vector<2x32xf32>
    %106 = vector.extract_strided_slice %94 {offsets = [0, 64], sizes = [2, 32], strides = [1, 1]} : vector<2x96xf32> to vector<2x32xf32>
    %107 = vector.extract_strided_slice %95 {offsets = [0, 64], sizes = [2, 32], strides = [1, 1]} : vector<2x96xf32> to vector<2x32xf32>
    %108 = arith.addf %107, %5 : vector<2x32xf32>
    %109 = arith.mulf %104, %108 : vector<2x32xf32>
    %110 = arith.addf %106, %109 : vector<2x32xf32>
    %111 = math.tanh %110 : vector<2x32xf32>
    %cst_32 = arith.constant 1.000000e+00 : f32
    %112 = vector.broadcast %cst_32 : f32 to vector<2x32xf32>
    %113 = arith.subf %112, %105 : vector<2x32xf32>
    %114 = arith.mulf %113, %111 : vector<2x32xf32>
    %115 = arith.mulf %105, %91 : vector<2x32xf32>
    %116 = arith.addf %114, %115 : vector<2x32xf32>
    %cst_33 = arith.constant dense<0.000000e+00> : vector<2x96xf32>
    %117 = tpu.matmul %116, %2, %cst_33 {dimension_numbers = #tpu.dot_dimension_numbers<[1], [0], [0], [1], [0, 0, 1, 1], [], []>} : vector<2x32xf32>, vector<32x96xf32>, vector<2x96xf32> -> vector<2x96xf32>
    %118 = arith.addf %117, %11 : vector<2x96xf32>
    %119 = vector.extract_strided_slice %17 {offsets = [8, 0], sizes = [2, 96], strides = [1, 1]} : vector<16x96xf32> to vector<2x96xf32>
    %cst_34 = arith.constant dense<0.000000e+00> : vector<2x96xf32>
    %120 = tpu.matmul %116, %0, %cst_34 {dimension_numbers = #tpu.dot_dimension_numbers<[1], [0], [0], [1], [0, 0, 1, 1], [], []>} : vector<2x32xf32>, vector<32x96xf32>, vector<2x96xf32> -> vector<2x96xf32>
    %121 = vector.extract_strided_slice %119 {offsets = [0, 0], sizes = [2, 64], strides = [1, 1]} : vector<2x96xf32> to vector<2x64xf32>
    %122 = vector.extract_strided_slice %120 {offsets = [0, 0], sizes = [2, 64], strides = [1, 1]} : vector<2x96xf32> to vector<2x64xf32>
    %123 = arith.addf %121, %122 : vector<2x64xf32>
    %124 = arith.negf %123 : vector<2x64xf32>
    %125 = math.exp %124 : vector<2x64xf32>
    %cst_35 = arith.constant 1.000000e+00 : f32
    %126 = vector.broadcast %cst_35 : f32 to vector<2x64xf32>
    %127 = arith.addf %126, %125 : vector<2x64xf32>
    %128 = arith.divf %126, %127 : vector<2x64xf32>
    %129 = vector.extract_strided_slice %128 {offsets = [0, 0], sizes = [2, 32], strides = [1, 1]} : vector<2x64xf32> to vector<2x32xf32>
    %130 = vector.extract_strided_slice %128 {offsets = [0, 32], sizes = [2, 32], strides = [1, 1]} : vector<2x64xf32> to vector<2x32xf32>
    %131 = vector.extract_strided_slice %119 {offsets = [0, 64], sizes = [2, 32], strides = [1, 1]} : vector<2x96xf32> to vector<2x32xf32>
    %132 = vector.extract_strided_slice %120 {offsets = [0, 64], sizes = [2, 32], strides = [1, 1]} : vector<2x96xf32> to vector<2x32xf32>
    %133 = arith.addf %132, %5 : vector<2x32xf32>
    %134 = arith.mulf %129, %133 : vector<2x32xf32>
    %135 = arith.addf %131, %134 : vector<2x32xf32>
    %136 = math.tanh %135 : vector<2x32xf32>
    %cst_36 = arith.constant 1.000000e+00 : f32
    %137 = vector.broadcast %cst_36 : f32 to vector<2x32xf32>
    %138 = arith.subf %137, %130 : vector<2x32xf32>
    %139 = arith.mulf %138, %136 : vector<2x32xf32>
    %140 = arith.mulf %130, %116 : vector<2x32xf32>
    %141 = arith.addf %139, %140 : vector<2x32xf32>
    %cst_37 = arith.constant dense<0.000000e+00> : vector<2x96xf32>
    %142 = tpu.matmul %141, %2, %cst_37 {dimension_numbers = #tpu.dot_dimension_numbers<[1], [0], [0], [1], [0, 0, 1, 1], [], []>} : vector<2x32xf32>, vector<32x96xf32>, vector<2x96xf32> -> vector<2x96xf32>
    %143 = arith.addf %142, %11 : vector<2x96xf32>
    %144 = vector.extract_strided_slice %17 {offsets = [10, 0], sizes = [2, 96], strides = [1, 1]} : vector<16x96xf32> to vector<2x96xf32>
    %cst_38 = arith.constant dense<0.000000e+00> : vector<2x96xf32>
    %145 = tpu.matmul %141, %0, %cst_38 {dimension_numbers = #tpu.dot_dimension_numbers<[1], [0], [0], [1], [0, 0, 1, 1], [], []>} : vector<2x32xf32>, vector<32x96xf32>, vector<2x96xf32> -> vector<2x96xf32>
    %146 = vector.extract_strided_slice %144 {offsets = [0, 0], sizes = [2, 64], strides = [1, 1]} : vector<2x96xf32> to vector<2x64xf32>
    %147 = vector.extract_strided_slice %145 {offsets = [0, 0], sizes = [2, 64], strides = [1, 1]} : vector<2x96xf32> to vector<2x64xf32>
    %148 = arith.addf %146, %147 : vector<2x64xf32>
    %149 = arith.negf %148 : vector<2x64xf32>
    %150 = math.exp %149 : vector<2x64xf32>
    %cst_39 = arith.constant 1.000000e+00 : f32
    %151 = vector.broadcast %cst_39 : f32 to vector<2x64xf32>
    %152 = arith.addf %151, %150 : vector<2x64xf32>
    %153 = arith.divf %151, %152 : vector<2x64xf32>
    %154 = vector.extract_strided_slice %153 {offsets = [0, 0], sizes = [2, 32], strides = [1, 1]} : vector<2x64xf32> to vector<2x32xf32>
    %155 = vector.extract_strided_slice %153 {offsets = [0, 32], sizes = [2, 32], strides = [1, 1]} : vector<2x64xf32> to vector<2x32xf32>
    %156 = vector.extract_strided_slice %144 {offsets = [0, 64], sizes = [2, 32], strides = [1, 1]} : vector<2x96xf32> to vector<2x32xf32>
    %157 = vector.extract_strided_slice %145 {offsets = [0, 64], sizes = [2, 32], strides = [1, 1]} : vector<2x96xf32> to vector<2x32xf32>
    %158 = arith.addf %157, %5 : vector<2x32xf32>
    %159 = arith.mulf %154, %158 : vector<2x32xf32>
    %160 = arith.addf %156, %159 : vector<2x32xf32>
    %161 = math.tanh %160 : vector<2x32xf32>
    %cst_40 = arith.constant 1.000000e+00 : f32
    %162 = vector.broadcast %cst_40 : f32 to vector<2x32xf32>
    %163 = arith.subf %162, %155 : vector<2x32xf32>
    %164 = arith.mulf %163, %161 : vector<2x32xf32>
    %165 = arith.mulf %155, %141 : vector<2x32xf32>
    %166 = arith.addf %164, %165 : vector<2x32xf32>
    %cst_41 = arith.constant dense<0.000000e+00> : vector<2x96xf32>
    %167 = tpu.matmul %166, %2, %cst_41 {dimension_numbers = #tpu.dot_dimension_numbers<[1], [0], [0], [1], [0, 0, 1, 1], [], []>} : vector<2x32xf32>, vector<32x96xf32>, vector<2x96xf32> -> vector<2x96xf32>
    %168 = arith.addf %167, %11 : vector<2x96xf32>
    %169 = vector.extract_strided_slice %17 {offsets = [12, 0], sizes = [2, 96], strides = [1, 1]} : vector<16x96xf32> to vector<2x96xf32>
    %cst_42 = arith.constant dense<0.000000e+00> : vector<2x96xf32>
    %170 = tpu.matmul %166, %0, %cst_42 {dimension_numbers = #tpu.dot_dimension_numbers<[1], [0], [0], [1], [0, 0, 1, 1], [], []>} : vector<2x32xf32>, vector<32x96xf32>, vector<2x96xf32> -> vector<2x96xf32>
    %171 = vector.extract_strided_slice %169 {offsets = [0, 0], sizes = [2, 64], strides = [1, 1]} : vector<2x96xf32> to vector<2x64xf32>
    %172 = vector.extract_strided_slice %170 {offsets = [0, 0], sizes = [2, 64], strides = [1, 1]} : vector<2x96xf32> to vector<2x64xf32>
    %173 = arith.addf %171, %172 : vector<2x64xf32>
    %174 = arith.negf %173 : vector<2x64xf32>
    %175 = math.exp %174 : vector<2x64xf32>
    %cst_43 = arith.constant 1.000000e+00 : f32
    %176 = vector.broadcast %cst_43 : f32 to vector<2x64xf32>
    %177 = arith.addf %176, %175 : vector<2x64xf32>
    %178 = arith.divf %176, %177 : vector<2x64xf32>
    %179 = vector.extract_strided_slice %178 {offsets = [0, 0], sizes = [2, 32], strides = [1, 1]} : vector<2x64xf32> to vector<2x32xf32>
    %180 = vector.extract_strided_slice %178 {offsets = [0, 32], sizes = [2, 32], strides = [1, 1]} : vector<2x64xf32> to vector<2x32xf32>
    %181 = vector.extract_strided_slice %169 {offsets = [0, 64], sizes = [2, 32], strides = [1, 1]} : vector<2x96xf32> to vector<2x32xf32>
    %182 = vector.extract_strided_slice %170 {offsets = [0, 64], sizes = [2, 32], strides = [1, 1]} : vector<2x96xf32> to vector<2x32xf32>
    %183 = arith.addf %182, %5 : vector<2x32xf32>
    %184 = arith.mulf %179, %183 : vector<2x32xf32>
    %185 = arith.addf %181, %184 : vector<2x32xf32>
    %186 = math.tanh %185 : vector<2x32xf32>
    %cst_44 = arith.constant 1.000000e+00 : f32
    %187 = vector.broadcast %cst_44 : f32 to vector<2x32xf32>
    %188 = arith.subf %187, %180 : vector<2x32xf32>
    %189 = arith.mulf %188, %186 : vector<2x32xf32>
    %190 = arith.mulf %180, %166 : vector<2x32xf32>
    %191 = arith.addf %189, %190 : vector<2x32xf32>
    %cst_45 = arith.constant dense<0.000000e+00> : vector<2x96xf32>
    %192 = tpu.matmul %191, %2, %cst_45 {dimension_numbers = #tpu.dot_dimension_numbers<[1], [0], [0], [1], [0, 0, 1, 1], [], []>} : vector<2x32xf32>, vector<32x96xf32>, vector<2x96xf32> -> vector<2x96xf32>
    %193 = arith.addf %192, %11 : vector<2x96xf32>
    %194 = vector.extract_strided_slice %17 {offsets = [14, 0], sizes = [2, 96], strides = [1, 1]} : vector<16x96xf32> to vector<2x96xf32>
    %cst_46 = arith.constant dense<0.000000e+00> : vector<2x96xf32>
    %195 = tpu.matmul %191, %0, %cst_46 {dimension_numbers = #tpu.dot_dimension_numbers<[1], [0], [0], [1], [0, 0, 1, 1], [], []>} : vector<2x32xf32>, vector<32x96xf32>, vector<2x96xf32> -> vector<2x96xf32>
    %196 = vector.extract_strided_slice %194 {offsets = [0, 0], sizes = [2, 64], strides = [1, 1]} : vector<2x96xf32> to vector<2x64xf32>
    %197 = vector.extract_strided_slice %195 {offsets = [0, 0], sizes = [2, 64], strides = [1, 1]} : vector<2x96xf32> to vector<2x64xf32>
    %198 = arith.addf %196, %197 : vector<2x64xf32>
    %199 = arith.negf %198 : vector<2x64xf32>
    %200 = math.exp %199 : vector<2x64xf32>
    %cst_47 = arith.constant 1.000000e+00 : f32
    %201 = vector.broadcast %cst_47 : f32 to vector<2x64xf32>
    %202 = arith.addf %201, %200 : vector<2x64xf32>
    %203 = arith.divf %201, %202 : vector<2x64xf32>
    %204 = vector.extract_strided_slice %203 {offsets = [0, 0], sizes = [2, 32], strides = [1, 1]} : vector<2x64xf32> to vector<2x32xf32>
    %205 = vector.extract_strided_slice %203 {offsets = [0, 32], sizes = [2, 32], strides = [1, 1]} : vector<2x64xf32> to vector<2x32xf32>
    %206 = vector.extract_strided_slice %194 {offsets = [0, 64], sizes = [2, 32], strides = [1, 1]} : vector<2x96xf32> to vector<2x32xf32>
    %207 = vector.extract_strided_slice %195 {offsets = [0, 64], sizes = [2, 32], strides = [1, 1]} : vector<2x96xf32> to vector<2x32xf32>
    %208 = arith.addf %207, %5 : vector<2x32xf32>
    %209 = arith.mulf %204, %208 : vector<2x32xf32>
    %210 = arith.addf %206, %209 : vector<2x32xf32>
    %211 = math.tanh %210 : vector<2x32xf32>
    %cst_48 = arith.constant 1.000000e+00 : f32
    %212 = vector.broadcast %cst_48 : f32 to vector<2x32xf32>
    %213 = arith.subf %212, %205 : vector<2x32xf32>
    %214 = arith.mulf %213, %211 : vector<2x32xf32>
    %215 = arith.mulf %205, %191 : vector<2x32xf32>
    %216 = arith.addf %214, %215 : vector<2x32xf32>
    %cst_49 = arith.constant dense<0.000000e+00> : vector<2x96xf32>
    %217 = tpu.matmul %216, %2, %cst_49 {dimension_numbers = #tpu.dot_dimension_numbers<[1], [0], [0], [1], [0, 0, 1, 1], [], []>} : vector<2x32xf32>, vector<32x96xf32>, vector<2x96xf32> -> vector<2x96xf32>
    %218 = arith.addf %217, %11 : vector<2x96xf32>
    %cst_50 = arith.constant dense<0.000000e+00> : vector<2x96xf32>
    %219 = tpu.matmul %216, %1, %cst_50 {dimension_numbers = #tpu.dot_dimension_numbers<[1], [0], [0], [1], [0, 0, 1, 1], [], []>} : vector<2x32xf32>, vector<32x96xf32>, vector<2x96xf32> -> vector<2x96xf32>
    %220 = vector.extract_strided_slice %43 {offsets = [0, 0], sizes = [2, 64], strides = [1, 1]} : vector<2x96xf32> to vector<2x64xf32>
    %221 = vector.extract_strided_slice %219 {offsets = [0, 0], sizes = [2, 64], strides = [1, 1]} : vector<2x96xf32> to vector<2x64xf32>
    %222 = arith.addf %220, %221 : vector<2x64xf32>
    %223 = arith.negf %222 : vector<2x64xf32>
    %224 = math.exp %223 : vector<2x64xf32>
    %cst_51 = arith.constant 1.000000e+00 : f32
    %225 = vector.broadcast %cst_51 : f32 to vector<2x64xf32>
    %226 = arith.addf %225, %224 : vector<2x64xf32>
    %227 = arith.divf %225, %226 : vector<2x64xf32>
    %228 = vector.extract_strided_slice %227 {offsets = [0, 0], sizes = [2, 32], strides = [1, 1]} : vector<2x64xf32> to vector<2x32xf32>
    %229 = vector.extract_strided_slice %227 {offsets = [0, 32], sizes = [2, 32], strides = [1, 1]} : vector<2x64xf32> to vector<2x32xf32>
    %230 = vector.extract_strided_slice %43 {offsets = [0, 64], sizes = [2, 32], strides = [1, 1]} : vector<2x96xf32> to vector<2x32xf32>
    %231 = vector.extract_strided_slice %219 {offsets = [0, 64], sizes = [2, 32], strides = [1, 1]} : vector<2x96xf32> to vector<2x32xf32>
    %232 = arith.addf %231, %8 : vector<2x32xf32>
    %233 = arith.mulf %228, %232 : vector<2x32xf32>
    %234 = arith.addf %230, %233 : vector<2x32xf32>
    %235 = math.tanh %234 : vector<2x32xf32>
    %cst_52 = arith.constant 1.000000e+00 : f32
    %236 = vector.broadcast %cst_52 : f32 to vector<2x32xf32>
    %237 = arith.subf %236, %229 : vector<2x32xf32>
    %238 = arith.mulf %237, %235 : vector<2x32xf32>
    %239 = arith.mulf %229, %216 : vector<2x32xf32>
    %240 = arith.addf %238, %239 : vector<2x32xf32>
    %cst_53 = arith.constant dense<0.000000e+00> : vector<2x96xf32>
    %241 = tpu.matmul %240, %1, %cst_53 {dimension_numbers = #tpu.dot_dimension_numbers<[1], [0], [0], [1], [0, 0, 1, 1], [], []>} : vector<2x32xf32>, vector<32x96xf32>, vector<2x96xf32> -> vector<2x96xf32>
    %242 = vector.extract_strided_slice %68 {offsets = [0, 0], sizes = [2, 64], strides = [1, 1]} : vector<2x96xf32> to vector<2x64xf32>
    %243 = vector.extract_strided_slice %241 {offsets = [0, 0], sizes = [2, 64], strides = [1, 1]} : vector<2x96xf32> to vector<2x64xf32>
    %244 = arith.addf %242, %243 : vector<2x64xf32>
    %245 = arith.negf %244 : vector<2x64xf32>
    %246 = math.exp %245 : vector<2x64xf32>
    %cst_54 = arith.constant 1.000000e+00 : f32
    %247 = vector.broadcast %cst_54 : f32 to vector<2x64xf32>
    %248 = arith.addf %247, %246 : vector<2x64xf32>
    %249 = arith.divf %247, %248 : vector<2x64xf32>
    %250 = vector.extract_strided_slice %249 {offsets = [0, 0], sizes = [2, 32], strides = [1, 1]} : vector<2x64xf32> to vector<2x32xf32>
    %251 = vector.extract_strided_slice %249 {offsets = [0, 32], sizes = [2, 32], strides = [1, 1]} : vector<2x64xf32> to vector<2x32xf32>
    %252 = vector.extract_strided_slice %68 {offsets = [0, 64], sizes = [2, 32], strides = [1, 1]} : vector<2x96xf32> to vector<2x32xf32>
    %253 = vector.extract_strided_slice %241 {offsets = [0, 64], sizes = [2, 32], strides = [1, 1]} : vector<2x96xf32> to vector<2x32xf32>
    %254 = arith.addf %253, %8 : vector<2x32xf32>
    %255 = arith.mulf %250, %254 : vector<2x32xf32>
    %256 = arith.addf %252, %255 : vector<2x32xf32>
    %257 = math.tanh %256 : vector<2x32xf32>
    %cst_55 = arith.constant 1.000000e+00 : f32
    %258 = vector.broadcast %cst_55 : f32 to vector<2x32xf32>
    %259 = arith.subf %258, %251 : vector<2x32xf32>
    %260 = arith.mulf %259, %257 : vector<2x32xf32>
    %261 = arith.mulf %251, %240 : vector<2x32xf32>
    %262 = arith.addf %260, %261 : vector<2x32xf32>
    %cst_56 = arith.constant dense<0.000000e+00> : vector<2x96xf32>
    %263 = tpu.matmul %262, %1, %cst_56 {dimension_numbers = #tpu.dot_dimension_numbers<[1], [0], [0], [1], [0, 0, 1, 1], [], []>} : vector<2x32xf32>, vector<32x96xf32>, vector<2x96xf32> -> vector<2x96xf32>
    %264 = vector.extract_strided_slice %93 {offsets = [0, 0], sizes = [2, 64], strides = [1, 1]} : vector<2x96xf32> to vector<2x64xf32>
    %265 = vector.extract_strided_slice %263 {offsets = [0, 0], sizes = [2, 64], strides = [1, 1]} : vector<2x96xf32> to vector<2x64xf32>
    %266 = arith.addf %264, %265 : vector<2x64xf32>
    %267 = arith.negf %266 : vector<2x64xf32>
    %268 = math.exp %267 : vector<2x64xf32>
    %cst_57 = arith.constant 1.000000e+00 : f32
    %269 = vector.broadcast %cst_57 : f32 to vector<2x64xf32>
    %270 = arith.addf %269, %268 : vector<2x64xf32>
    %271 = arith.divf %269, %270 : vector<2x64xf32>
    %272 = vector.extract_strided_slice %271 {offsets = [0, 0], sizes = [2, 32], strides = [1, 1]} : vector<2x64xf32> to vector<2x32xf32>
    %273 = vector.extract_strided_slice %271 {offsets = [0, 32], sizes = [2, 32], strides = [1, 1]} : vector<2x64xf32> to vector<2x32xf32>
    %274 = vector.extract_strided_slice %93 {offsets = [0, 64], sizes = [2, 32], strides = [1, 1]} : vector<2x96xf32> to vector<2x32xf32>
    %275 = vector.extract_strided_slice %263 {offsets = [0, 64], sizes = [2, 32], strides = [1, 1]} : vector<2x96xf32> to vector<2x32xf32>
    %276 = arith.addf %275, %8 : vector<2x32xf32>
    %277 = arith.mulf %272, %276 : vector<2x32xf32>
    %278 = arith.addf %274, %277 : vector<2x32xf32>
    %279 = math.tanh %278 : vector<2x32xf32>
    %cst_58 = arith.constant 1.000000e+00 : f32
    %280 = vector.broadcast %cst_58 : f32 to vector<2x32xf32>
    %281 = arith.subf %280, %273 : vector<2x32xf32>
    %282 = arith.mulf %281, %279 : vector<2x32xf32>
    %283 = arith.mulf %273, %262 : vector<2x32xf32>
    %284 = arith.addf %282, %283 : vector<2x32xf32>
    %cst_59 = arith.constant dense<0.000000e+00> : vector<2x96xf32>
    %285 = tpu.matmul %284, %1, %cst_59 {dimension_numbers = #tpu.dot_dimension_numbers<[1], [0], [0], [1], [0, 0, 1, 1], [], []>} : vector<2x32xf32>, vector<32x96xf32>, vector<2x96xf32> -> vector<2x96xf32>
    %286 = vector.extract_strided_slice %118 {offsets = [0, 0], sizes = [2, 64], strides = [1, 1]} : vector<2x96xf32> to vector<2x64xf32>
    %287 = vector.extract_strided_slice %285 {offsets = [0, 0], sizes = [2, 64], strides = [1, 1]} : vector<2x96xf32> to vector<2x64xf32>
    %288 = arith.addf %286, %287 : vector<2x64xf32>
    %289 = arith.negf %288 : vector<2x64xf32>
    %290 = math.exp %289 : vector<2x64xf32>
    %cst_60 = arith.constant 1.000000e+00 : f32
    %291 = vector.broadcast %cst_60 : f32 to vector<2x64xf32>
    %292 = arith.addf %291, %290 : vector<2x64xf32>
    %293 = arith.divf %291, %292 : vector<2x64xf32>
    %294 = vector.extract_strided_slice %293 {offsets = [0, 0], sizes = [2, 32], strides = [1, 1]} : vector<2x64xf32> to vector<2x32xf32>
    %295 = vector.extract_strided_slice %293 {offsets = [0, 32], sizes = [2, 32], strides = [1, 1]} : vector<2x64xf32> to vector<2x32xf32>
    %296 = vector.extract_strided_slice %118 {offsets = [0, 64], sizes = [2, 32], strides = [1, 1]} : vector<2x96xf32> to vector<2x32xf32>
    %297 = vector.extract_strided_slice %285 {offsets = [0, 64], sizes = [2, 32], strides = [1, 1]} : vector<2x96xf32> to vector<2x32xf32>
    %298 = arith.addf %297, %8 : vector<2x32xf32>
    %299 = arith.mulf %294, %298 : vector<2x32xf32>
    %300 = arith.addf %296, %299 : vector<2x32xf32>
    %301 = math.tanh %300 : vector<2x32xf32>
    %cst_61 = arith.constant 1.000000e+00 : f32
    %302 = vector.broadcast %cst_61 : f32 to vector<2x32xf32>
    %303 = arith.subf %302, %295 : vector<2x32xf32>
    %304 = arith.mulf %303, %301 : vector<2x32xf32>
    %305 = arith.mulf %295, %284 : vector<2x32xf32>
    %306 = arith.addf %304, %305 : vector<2x32xf32>
    %cst_62 = arith.constant dense<0.000000e+00> : vector<2x96xf32>
    %307 = tpu.matmul %306, %1, %cst_62 {dimension_numbers = #tpu.dot_dimension_numbers<[1], [0], [0], [1], [0, 0, 1, 1], [], []>} : vector<2x32xf32>, vector<32x96xf32>, vector<2x96xf32> -> vector<2x96xf32>
    %308 = vector.extract_strided_slice %143 {offsets = [0, 0], sizes = [2, 64], strides = [1, 1]} : vector<2x96xf32> to vector<2x64xf32>
    %309 = vector.extract_strided_slice %307 {offsets = [0, 0], sizes = [2, 64], strides = [1, 1]} : vector<2x96xf32> to vector<2x64xf32>
    %310 = arith.addf %308, %309 : vector<2x64xf32>
    %311 = arith.negf %310 : vector<2x64xf32>
    %312 = math.exp %311 : vector<2x64xf32>
    %cst_63 = arith.constant 1.000000e+00 : f32
    %313 = vector.broadcast %cst_63 : f32 to vector<2x64xf32>
    %314 = arith.addf %313, %312 : vector<2x64xf32>
    %315 = arith.divf %313, %314 : vector<2x64xf32>
    %316 = vector.extract_strided_slice %315 {offsets = [0, 0], sizes = [2, 32], strides = [1, 1]} : vector<2x64xf32> to vector<2x32xf32>
    %317 = vector.extract_strided_slice %315 {offsets = [0, 32], sizes = [2, 32], strides = [1, 1]} : vector<2x64xf32> to vector<2x32xf32>
    %318 = vector.extract_strided_slice %143 {offsets = [0, 64], sizes = [2, 32], strides = [1, 1]} : vector<2x96xf32> to vector<2x32xf32>
    %319 = vector.extract_strided_slice %307 {offsets = [0, 64], sizes = [2, 32], strides = [1, 1]} : vector<2x96xf32> to vector<2x32xf32>
    %320 = arith.addf %319, %8 : vector<2x32xf32>
    %321 = arith.mulf %316, %320 : vector<2x32xf32>
    %322 = arith.addf %318, %321 : vector<2x32xf32>
    %323 = math.tanh %322 : vector<2x32xf32>
    %cst_64 = arith.constant 1.000000e+00 : f32
    %324 = vector.broadcast %cst_64 : f32 to vector<2x32xf32>
    %325 = arith.subf %324, %317 : vector<2x32xf32>
    %326 = arith.mulf %325, %323 : vector<2x32xf32>
    %327 = arith.mulf %317, %306 : vector<2x32xf32>
    %328 = arith.addf %326, %327 : vector<2x32xf32>
    %cst_65 = arith.constant dense<0.000000e+00> : vector<2x96xf32>
    %329 = tpu.matmul %328, %1, %cst_65 {dimension_numbers = #tpu.dot_dimension_numbers<[1], [0], [0], [1], [0, 0, 1, 1], [], []>} : vector<2x32xf32>, vector<32x96xf32>, vector<2x96xf32> -> vector<2x96xf32>
    %330 = vector.extract_strided_slice %168 {offsets = [0, 0], sizes = [2, 64], strides = [1, 1]} : vector<2x96xf32> to vector<2x64xf32>
    %331 = vector.extract_strided_slice %329 {offsets = [0, 0], sizes = [2, 64], strides = [1, 1]} : vector<2x96xf32> to vector<2x64xf32>
    %332 = arith.addf %330, %331 : vector<2x64xf32>
    %333 = arith.negf %332 : vector<2x64xf32>
    %334 = math.exp %333 : vector<2x64xf32>
    %cst_66 = arith.constant 1.000000e+00 : f32
    %335 = vector.broadcast %cst_66 : f32 to vector<2x64xf32>
    %336 = arith.addf %335, %334 : vector<2x64xf32>
    %337 = arith.divf %335, %336 : vector<2x64xf32>
    %338 = vector.extract_strided_slice %337 {offsets = [0, 0], sizes = [2, 32], strides = [1, 1]} : vector<2x64xf32> to vector<2x32xf32>
    %339 = vector.extract_strided_slice %337 {offsets = [0, 32], sizes = [2, 32], strides = [1, 1]} : vector<2x64xf32> to vector<2x32xf32>
    %340 = vector.extract_strided_slice %168 {offsets = [0, 64], sizes = [2, 32], strides = [1, 1]} : vector<2x96xf32> to vector<2x32xf32>
    %341 = vector.extract_strided_slice %329 {offsets = [0, 64], sizes = [2, 32], strides = [1, 1]} : vector<2x96xf32> to vector<2x32xf32>
    %342 = arith.addf %341, %8 : vector<2x32xf32>
    %343 = arith.mulf %338, %342 : vector<2x32xf32>
    %344 = arith.addf %340, %343 : vector<2x32xf32>
    %345 = math.tanh %344 : vector<2x32xf32>
    %cst_67 = arith.constant 1.000000e+00 : f32
    %346 = vector.broadcast %cst_67 : f32 to vector<2x32xf32>
    %347 = arith.subf %346, %339 : vector<2x32xf32>
    %348 = arith.mulf %347, %345 : vector<2x32xf32>
    %349 = arith.mulf %339, %328 : vector<2x32xf32>
    %350 = arith.addf %348, %349 : vector<2x32xf32>
    %cst_68 = arith.constant dense<0.000000e+00> : vector<2x96xf32>
    %351 = tpu.matmul %350, %1, %cst_68 {dimension_numbers = #tpu.dot_dimension_numbers<[1], [0], [0], [1], [0, 0, 1, 1], [], []>} : vector<2x32xf32>, vector<32x96xf32>, vector<2x96xf32> -> vector<2x96xf32>
    %352 = vector.extract_strided_slice %193 {offsets = [0, 0], sizes = [2, 64], strides = [1, 1]} : vector<2x96xf32> to vector<2x64xf32>
    %353 = vector.extract_strided_slice %351 {offsets = [0, 0], sizes = [2, 64], strides = [1, 1]} : vector<2x96xf32> to vector<2x64xf32>
    %354 = arith.addf %352, %353 : vector<2x64xf32>
    %355 = arith.negf %354 : vector<2x64xf32>
    %356 = math.exp %355 : vector<2x64xf32>
    %cst_69 = arith.constant 1.000000e+00 : f32
    %357 = vector.broadcast %cst_69 : f32 to vector<2x64xf32>
    %358 = arith.addf %357, %356 : vector<2x64xf32>
    %359 = arith.divf %357, %358 : vector<2x64xf32>
    %360 = vector.extract_strided_slice %359 {offsets = [0, 0], sizes = [2, 32], strides = [1, 1]} : vector<2x64xf32> to vector<2x32xf32>
    %361 = vector.extract_strided_slice %359 {offsets = [0, 32], sizes = [2, 32], strides = [1, 1]} : vector<2x64xf32> to vector<2x32xf32>
    %362 = vector.extract_strided_slice %193 {offsets = [0, 64], sizes = [2, 32], strides = [1, 1]} : vector<2x96xf32> to vector<2x32xf32>
    %363 = vector.extract_strided_slice %351 {offsets = [0, 64], sizes = [2, 32], strides = [1, 1]} : vector<2x96xf32> to vector<2x32xf32>
    %364 = arith.addf %363, %8 : vector<2x32xf32>
    %365 = arith.mulf %360, %364 : vector<2x32xf32>
    %366 = arith.addf %362, %365 : vector<2x32xf32>
    %367 = math.tanh %366 : vector<2x32xf32>
    %cst_70 = arith.constant 1.000000e+00 : f32
    %368 = vector.broadcast %cst_70 : f32 to vector<2x32xf32>
    %369 = arith.subf %368, %361 : vector<2x32xf32>
    %370 = arith.mulf %369, %367 : vector<2x32xf32>
    %371 = arith.mulf %361, %350 : vector<2x32xf32>
    %372 = arith.addf %370, %371 : vector<2x32xf32>
    %cst_71 = arith.constant dense<0.000000e+00> : vector<2x96xf32>
    %373 = tpu.matmul %372, %1, %cst_71 {dimension_numbers = #tpu.dot_dimension_numbers<[1], [0], [0], [1], [0, 0, 1, 1], [], []>} : vector<2x32xf32>, vector<32x96xf32>, vector<2x96xf32> -> vector<2x96xf32>
    %374 = vector.extract_strided_slice %218 {offsets = [0, 0], sizes = [2, 64], strides = [1, 1]} : vector<2x96xf32> to vector<2x64xf32>
    %375 = vector.extract_strided_slice %373 {offsets = [0, 0], sizes = [2, 64], strides = [1, 1]} : vector<2x96xf32> to vector<2x64xf32>
    %376 = arith.addf %374, %375 : vector<2x64xf32>
    %377 = arith.negf %376 : vector<2x64xf32>
    %378 = math.exp %377 : vector<2x64xf32>
    %cst_72 = arith.constant 1.000000e+00 : f32
    %379 = vector.broadcast %cst_72 : f32 to vector<2x64xf32>
    %380 = arith.addf %379, %378 : vector<2x64xf32>
    %381 = arith.divf %379, %380 : vector<2x64xf32>
    %382 = vector.extract_strided_slice %381 {offsets = [0, 0], sizes = [2, 32], strides = [1, 1]} : vector<2x64xf32> to vector<2x32xf32>
    %383 = vector.extract_strided_slice %381 {offsets = [0, 32], sizes = [2, 32], strides = [1, 1]} : vector<2x64xf32> to vector<2x32xf32>
    %384 = vector.extract_strided_slice %218 {offsets = [0, 64], sizes = [2, 32], strides = [1, 1]} : vector<2x96xf32> to vector<2x32xf32>
    %385 = vector.extract_strided_slice %373 {offsets = [0, 64], sizes = [2, 32], strides = [1, 1]} : vector<2x96xf32> to vector<2x32xf32>
    %386 = arith.addf %385, %8 : vector<2x32xf32>
    %387 = arith.mulf %382, %386 : vector<2x32xf32>
    %388 = arith.addf %384, %387 : vector<2x32xf32>
    %389 = math.tanh %388 : vector<2x32xf32>
    %cst_73 = arith.constant 1.000000e+00 : f32
    %390 = vector.broadcast %cst_73 : f32 to vector<2x32xf32>
    %391 = arith.subf %390, %383 : vector<2x32xf32>
    %392 = arith.mulf %391, %389 : vector<2x32xf32>
    %393 = arith.mulf %383, %372 : vector<2x32xf32>
    %394 = arith.addf %392, %393 : vector<2x32xf32>
    %c0_74 = arith.constant 0 : index
    %c0_75 = arith.constant 0 : index
    %395 = vector.load %arg16[%c0_74, %c0_75] : memref<2x32xf32, #tpu.memory_space<vmem>>, vector<2x32xf32>
    tpu.vector_store %arg16[%c0_74, %c0_75], %394 {strides = array<i32>} : memref<2x32xf32, #tpu.memory_space<vmem>>, vector<2x32xf32>,
    %c0_76 = arith.constant 0 : index
    %c0_77 = arith.constant 0 : index
    %396 = vector.load %arg9[%c0_76, %c0_77] : memref<32x128xf32, #tpu.memory_space<vmem>>, vector<32x128xf32>
    %cst_78 = arith.constant dense<0.000000e+00> : vector<2x128xf32>
    %397 = tpu.matmul %394, %396, %cst_78 {dimension_numbers = #tpu.dot_dimension_numbers<[1], [0], [0], [1], [0, 0, 1, 1], [], []>} : vector<2x32xf32>, vector<32x128xf32>, vector<2x128xf32> -> vector<2x128xf32>
    %c0_79 = arith.constant 0 : index
    %c0_80 = arith.constant 0 : index
    %398 = vector.load %arg10[%c0_79, %c0_80] : memref<1x128xf32, #tpu.memory_space<vmem>>, vector<1x128xf32>
    %399 = vector.broadcast %398 : vector<1x128xf32> to vector<2x128xf32>
    %400 = arith.addf %397, %399 : vector<2x128xf32>
    %cst_81 = arith.constant 0.000000e+00 : f32
    %401 = vector.broadcast %cst_81 : f32 to vector<2x128xf32>
    %402 = arith.maximumf %400, %401 : vector<2x128xf32>
    %c0_82 = arith.constant 0 : index
    %c0_83 = arith.constant 0 : index
    %403 = vector.load %arg11[%c0_82, %c0_83] : memref<128x128xf32, #tpu.memory_space<vmem>>, vector<128x128xf32>
    %cst_84 = arith.constant dense<0.000000e+00> : vector<2x128xf32>
    %404 = tpu.matmul %402, %403, %cst_84 {dimension_numbers = #tpu.dot_dimension_numbers<[1], [0], [0], [1], [0, 0, 1, 1], [], []>} : vector<2x128xf32>, vector<128x128xf32>, vector<2x128xf32> -> vector<2x128xf32>
    %c0_85 = arith.constant 0 : index
    %c0_86 = arith.constant 0 : index
    %405 = vector.load %arg12[%c0_85, %c0_86] : memref<1x128xf32, #tpu.memory_space<vmem>>, vector<1x128xf32>
    %406 = vector.broadcast %405 : vector<1x128xf32> to vector<2x128xf32>
    %407 = arith.addf %404, %406 : vector<2x128xf32>
    %cst_87 = arith.constant 0.000000e+00 : f32
    %408 = vector.broadcast %cst_87 : f32 to vector<2x128xf32>
    %409 = arith.maximumf %407, %408 : vector<2x128xf32>
    %c0_88 = arith.constant 0 : index
    %c0_89 = arith.constant 0 : index
    %410 = vector.load %arg13[%c0_88, %c0_89] : memref<128x3xf32, #tpu.memory_space<vmem>>, vector<128x3xf32>
    %cst_90 = arith.constant dense<0.000000e+00> : vector<2x3xf32>
    %411 = tpu.matmul %409, %410, %cst_90 {dimension_numbers = #tpu.dot_dimension_numbers<[1], [0], [0], [1], [0, 0, 1, 1], [], []>} : vector<2x128xf32>, vector<128x3xf32>, vector<2x3xf32> -> vector<2x3xf32>
    %c0_91 = arith.constant 0 : index
    %c0_92 = arith.constant 0 : index
    %412 = vector.load %arg14[%c0_91, %c0_92] : memref<1x3xf32, #tpu.memory_space<vmem>>, vector<1x3xf32>
    %413 = vector.broadcast %412 : vector<1x3xf32> to vector<2x3xf32>
    %414 = arith.addf %411, %413 : vector<2x3xf32>
    %c0_93 = arith.constant 0 : index
    %c0_94 = arith.constant 0 : index
    %415 = vector.load %arg15[%c0_93, %c0_94] : memref<2x3xf32, #tpu.memory_space<vmem>>, vector<2x3xf32>
    tpu.vector_store %arg15[%c0_93, %c0_94], %414 {strides = array<i32>} : memref<2x3xf32, #tpu.memory_space<vmem>>, vector<2x3xf32>,
    return
  }
}

</mosaic_0001>

<bundles_post_ra>
// kernel: myrnn_forward.1
= control target key start
LH: loop header
LB: loop body
LE: loop exit
PB: predicated region body
PF: predicated region fallthrough
CT: control target
= control target key end

     0   :  { %s4385_s0 = inlined_call_operand.vmem [shape: f32[16,101], index: 0, kind: input, shape index: {}]   ;;  %s4386_s1 = inlined_call_operand.vmem [shape: f32[101,96], index: 1, kind: input, shape index: {}]   ;;  %s4387_s2 = inlined_call_operand.vmem [shape: f32[32,96], index: 2, kind: input, shape index: {}]   ;;  %s4388_s3 = inlined_call_operand.vmem [shape: f32[1,96], index: 3, kind: input, shape index: {}]   ;;  %s4389_s4 = inlined_call_operand.vmem [shape: f32[1,32], index: 4, kind: input, shape index: {}]   ;;  %s4390_s5 = inlined_call_operand.vmem [shape: f32[32,96], index: 5, kind: input, shape index: {}]   ;;  %s4391_s6 = inlined_call_operand.vmem [shape: f32[32,96], index: 6, kind: input, shape index: {}]   ;;  %s4392_s7 = inlined_call_operand.vmem [shape: f32[1,96], index: 7, kind: input, shape index: {}]   ;;  %s4393_s8 = inlined_call_operand.vmem [shape: f32[1,32], index: 8, kind: input, shape index: {}]   ;;  %s4394_s9 = inlined_call_operand.vmem [shape: f32[32,128], index: 9, kind: input, shape index: {}]   ;;  %s4395_s10 = inlined_call_operand.vmem [shape: f32[1,128], index: 10, kind: input, shape index: {}]   ;;  %s4396_s11 = inlined_call_operand.vmem [shape: f32[128,128], index: 11, kind: input, shape index: {}]   ;;  %s4397_s12 = inlined_call_operand.vmem [shape: f32[1,128], index: 12, kind: input, shape index: {}]   ;;  %s4398_s13 = inlined_call_operand.vmem [shape: f32[128,3], index: 13, kind: input, shape index: {}]   ;;  %s4399_s14 = inlined_call_operand.vmem [shape: f32[1,3], index: 14, kind: input, shape index: {}]   ;;  %s4400_s15 = inlined_call_operand.hbm [shape: f32[2,3], index: 15, kind: output, shape index: {0}]   ;;  %s4401_s16 = inlined_call_operand.hbm [shape: f32[2,32], index: 16, kind: output, shape index: {1}]  }
   0x1   :  { %4403 = sst [smem:[#allocation8_spill]] %s4385_s0 }
   0x2   :  { %22 = vsyncpa [#allocation3], 0  ;;  %v87_v0 = vld [vmem:[%s4386_s1] sm:$0xff]  ;;  %v88_v1 = vld [vmem:[%s4386_s1 + $0x8] sm:$0xff]  ;;  %v3712_v3 = vmov 0.0|0.0   ;;  %vm3713_vm0 = vmmov 0  }
   0x3   :  { %v54_v2 = vld [vmem:[%s4387_s2] sm:$0xff]  ;;  %3363 = vmatprep.subr.bf16.mxu1 %v3712_v3  ;;  %v3339_v4 = vpack.c.bf16 %v88_v1, %v87_v0  ;;  %v55_v5 = vld [vmem:[%s4387_s2 + $0x8] sm:$0xff]  ;;  %v89_v6 = vld [vmem:[%s4386_s1 + $0x10] sm:$0xff]  ;;  %v3714_v8 = vmov 0.0   ;;  %vm107_vm1 = vcmask 826368   ;;  %s4404_s29 = sld [smem:[#allocation8_spill]] }
   0x4   :  { %v90_v7 = vld [vmem:[%s4386_s1 + $0x18] sm:$0xff]  ;;  %3002 = vmatprep.mubr.msk.f32.mxu1 %vm3713_vm0, %v3714_v8  ;;  %v3825_v9 = vpack.c.bf16 %v55_v5, %v54_v2  ;;  %v56_v11 = vld [vmem:[%s4387_s2 + $0x10] sm:$0xff]  ;;  %v91_v13 = vld [vmem:[%s4386_s1 + $0x20] sm:$0xff] }
   0x5   :  { %v3343_v10 = vpack.c.bf16 %v90_v7, %v89_v6  ;;  %v57_v12 = vld [vmem:[%s4387_s2 + $0x18] sm:$0xff]  ;;  %3340 = vmatprep.subr.bf16.mxu0 %v3339_v4  ;;  %v92_v14 = vld [vmem:[%s4386_s1 + $0x28] sm:$0xff]  ;;  %v93_v17 = vld [vmem:[%s4386_s1 + $0x30] sm:$0xff] }
   0x6   :  { %3365 = vmatpush3.bf16.msra.mxu1 %v3825_v9  ;;  %3342 = vmatpush3.bf16.msra.mxu0 %v3339_v4  ;;  %v3840_v15 = vpack.c.bf16 %v57_v12, %v56_v11  ;;  %v3347_v16 = vpack.c.bf16 %v92_v14, %v91_v13  ;;  %v94_v19 = vld [vmem:[%s4386_s1 + $0x38] sm:$0xff]  ;;  %v2741_v20 = vld [vmem:[%s4389_s4] ss:$0 sm:$0xff] }
   0x7   :  { %3366 = vmatprep.subr.bf16.mxu1 %v3712_v3  ;;  %3344 = vmatprep.subr.bf16.mxu0 %v3343_v10 }
   0x9   :  { %v85_v18 = vld [vmem:[%s4404_s29] sm:$0xff] }
   0xa   :  { %2991 = vmatprep.mubr.msk.f32.mxu0 %vm107_vm1, %v85_v18 }
   0xb   :  { %23 = vsyncpa [#allocation5], 0  ;;  %s3715_s19 = smov 64   ;;  %3368 = vmatpush3.bf16.msra.mxu1 %v3840_v15  ;;  %3346 = vmatpush3.bf16.msra.mxu0 %v3343_v10  ;;  %v3351_v21 = vpack.c.bf16 %v94_v19, %v93_v17  ;;  %v95_v22 = vld [vmem:[%s4386_s1 + $0x40] sm:$0xff]  ;;  %v96_v23 = vld [vmem:[%s4386_s1 + $0x48] sm:$0xff]  ;;  %vm114_vm2 = vcmask 1044480  }
   0xc   :  { %274 = vrot.lane.b32.xlu0 %v2741_v20, %s3715_s19  ;;  %3348 = vmatprep.subr.bf16.mxu0 %v3347_v16  ;;  %v3355_v24 = vpack.c.bf16 %v96_v23, %v95_v22  ;;  %v97_v25 = vld [vmem:[%s4386_s1 + $0x50] sm:$0xff]  ;;  %v98_v26 = vld [vmem:[%s4386_s1 + $0x58] sm:$0xff]  ;;  %v99_v28 = vld [vmem:[%s4386_s1 + $0x60] sm:$0x1f]  ;;  %s3716_s4 = smov 96   ;;  %vm193_vm3 = vcmask 261120  }
   0xd   :  { %3369 = vmatprep.subr.bf16.mxu1 %v3712_v3  ;;  %v3359_v27 = vpack.c.bf16 %v98_v26, %v97_v25  ;;  %v86_v29 = vld [vmem:[%s4404_s29 + $0x8] sm:$0xff]  ;;  %v2744_v35 = vld [vmem:[%s4388_s3] ss:$0 sm:$0xff]  ;;  %v64_v50 = vld [vmem:[%s4390_s5 + $0x10] sm:$0xff]  ;;  %vm2438_vm4 = vcmask 254976  }
   0xe   :  { %3003 = vmatmul.mubr.f32.vlgmr.msra.gmra.mrb[0].mxu1 %v3714_v8  ;;  %v62_v48 = vld [vmem:[%s4390_s5] sm:$0xff]  ;;  %v63_v49 = vld [vmem:[%s4390_s5 + $0x8] sm:$0xff]  ;;  %v65_v52 = vld [vmem:[%s4390_s5 + $0x18] sm:$0xff] }
   0xf   :  { %3350 = vmatpush3.bf16.msra.mxu0 %v3347_v16  ;;  %3013 = vmatprep.mubr.msk.f32.mxu1 %vm3713_vm0, %v3714_v8  ;;  %v3911_v51 = vpack.c.bf16 %v63_v49, %v62_v48  ;;  %v3917_v53 = vpack.c.bf16 %v65_v52, %v64_v50 }
  0x10   :  { %3352 = vmatprep.subr.bf16.mxu0 %v3351_v21 }
  0x11   :  { %3371 = vmatpush3.bf16.msra.mxu1 %v3911_v51 }
  0x12   :  { %3372 = vmatprep.subr.bf16.mxu1 %v3712_v3 }
  0x13   :  { %3354 = vmatpush3.bf16.msra.mxu0 %v3351_v21 }
  0x14   :  { %3356 = vmatprep.subr.bf16.mxu0 %v3355_v24 }
  0x15   :  { %3374 = vmatpush3.bf16.msra.mxu1 %v3917_v53 }
  0x16   :  { %3375 = vmatprep.subr.bf16.mxu1 %v3712_v3 }
  0x17   :  { %3358 = vmatpush3.bf16.msra.mxu0 %v3355_v24 }
  0x18   :  { %3360 = vmatprep.subr.bf16.mxu0 %v3359_v27 }
  0x1b   :  { %3362 = vmatpush3.bf16.msra.mxu0 %v3359_v27 }
  0x1c   :  { %2989 = vmatprep.subr.msk.mxu0 %vm114_vm2, %v99_v28 }
  0x1f   :  { %2990 = vmatpush3.msk.msra.mxu0 %vm114_vm2, %v99_v28 }
  0x20   :  { %2992 = vmatmul.mubr.msk.f32.vlgmr.msra.gmra.mrb[0].mxu0 %vm107_vm1, %v86_v29  ;;  %3387 = vmatprep.subr.bf16.mxu0 %v3712_v3 }
  0x21   :  { %3389 = vmatpush3.bf16.msra.mxu0 %v3825_v9  ;;  %3046 = vmatprep.mubr.msk.f32.mxu0 %vm3713_vm0, %v3714_v8 }
  0x22   :  { %3390 = vmatprep.subr.bf16.mxu0 %v3712_v3 }
  0x25   :  { %3392 = vmatpush3.bf16.msra.mxu0 %v3840_v15 }
  0x26   :  { %3399 = vmatprep.subr.bf16.mxu0 %v3712_v3 }
  0x7e   :  { %v3888_v30 = vpop.permute.xlu0 %274 }
  0xe1   :  { %v263_v31 = vpop.f32.mrb[0].mxu1 }
  0xe2   :  { %v277_v32 = vadd.f32 %v3888_v30, %v263_v31  ;;  %v3004_v33 = vpop.f32.mrb[1].mxu1 }
  0xe4   :  { %279 = vrot.lane.b32.xlu0 %v277_v32, %s3715_s19 }
  0xf3   :  { %v2993_v34 = vpop.f32.mrb[0].mxu0 }
  0xf4   :  { %v3895_v36 = vadd.f32 %v2993_v34, %v2744_v35  ;;  %v184_v37 = vpop.f32.mrb[1].mxu0 }
  0xf5   :  { %v3897_v38 = vadd.f32 %v2744_v35, %v184_v37 }
  0xf7   :  { %v267_v39 = vadd.f32 %v263_v31, %v3897_v38 }
  0xf9   :  { %v2748_v40 = vmul.f32 -1.442695, %v267_v39 }
  0xfb   :  { %3568 = vpow2.f32 %v2748_v40 }
 0x105   :  { %v3569_v41 = vpop.eup %3568 }
 0x106   :  { %v271_v42 = vadd.f32 1.0, %v3569_v41 }
 0x108   :  { %3570 = vrcp.f32 %v271_v42 }
 0x112   :  { %v3571_v43 = vpop.eup %3570 }
 0x113   :  { %v289_v55 = vsub.f32 1.0, %v3571_v43  ;;  %v295_v57 = vmul.f32 0.0, %v3571_v43 }
 0x156   :  { %v280_v44 = vpop.permute.xlu0 %279 }
 0x157   :  { %v282_v45 = vmul.f32 %v3571_v43, %v280_v44 }
 0x159   :  { %284 = vrot.lane.b32.xlu1 %v282_v45, %s3715_s19 }
 0x1cb   :  { %v285_v46 = vpop.permute.xlu1 %284 }
 0x1cc   :  { %v287_v47 = vadd.f32 %v285_v46, %v3897_v38 }
 0x1ce   :  { %3572 = vtanh.f32 %v287_v47 }
 0x1d8   :  { %v3573_v54 = vpop.eup %3572 }
 0x1d9   :  { %291 = vrot.lane.b32.xlu1 %v3573_v54, %s3716_s4 }
 0x24b   :  { %v292_v56 = vpop.permute.xlu1 %291 }
 0x24c   :  { %v294_v58 = vmul.f32 %v292_v56, %v289_v55 }
 0x24e   :  { %v296_v59 = vadd.f32 %v295_v57, %v294_v58 }
 0x250   :  { %298 = vrot.lane.b32.xlu0 %v296_v59, %s3716_s4  ;;  %v471_v18 = vrot.slane %v296_v59, 6 }
 0x2c2   :  { %v299_v60 = vpop.permute.xlu0 %298 }
 0x2c3   :  { %3014 = vmatmul.mubr.msk.f32.vlgmr.msra.gmra.mrb[2].mxu1 %vm193_vm3, %v299_v60 }
 0x2c4   :  { %3377 = vmatpush3.bf16.msra.mxu1 %v3825_v9  ;;  %3024 = vmatprep.mubr.msk.f32.mxu1 %vm3713_vm0, %v3714_v8 }
 0x2c5   :  { %3378 = vmatprep.subr.bf16.mxu1 %v3712_v3 }
 0x2c8   :  { %3380 = vmatpush3.bf16.msra.mxu1 %v3840_v15 }
 0x2c9   :  { %3381 = vmatprep.subr.bf16.mxu1 %v3712_v3 }
 0x2cb   :  { %3025 = vmatmul.mubr.msk.f32.vlgmr.msra.gmra.mrb[4].mxu1 %vm193_vm3, %v299_v60 }
 0x2cc   :  { %3383 = vmatpush3.bf16.msra.mxu1 %v3911_v51  ;;  %3035 = vmatprep.mubr.msk.f32.mxu1 %vm3713_vm0, %v3714_v8 }
 0x2cd   :  { %3384 = vmatprep.subr.bf16.mxu1 %v3712_v3 }
 0x2d0   :  { %3386 = vmatpush3.bf16.msra.mxu1 %v3917_v53 }
 0x2d1   :  { %3393 = vmatprep.subr.bf16.mxu1 %v3712_v3 }
 0x396   :  { %v3938_v61 = vpop.f32.mrb[2].mxu1 }
 0x397   :  { %v3015_v62 = vpop.f32.mrb[3].mxu1 }
 0x39e   :  { %v438_v63 = vpop.f32.mrb[4].mxu1 }
 0x39f   :  { %v452_v0 = vadd.f32 %v438_v63, %v3888_v30  ;;  %v3026_v1 = vpop.f32.mrb[5].mxu1  ;;  %v443_v4 = vrot.slane %v438_v63, 6 }
 0x3a1   :  { %v454_v2 = vrot.slane %v452_v0, 6  ;;  %v445_v5 = vadd.f32 %v443_v4, %v3897_v38 }
 0x3a3   :  { %455 = vrot.lane.b32.xlu1 %v454_v2, %s3715_s19  ;;  %v2751_v6 = vmul.f32 -1.442695, %v445_v5 }
 0x3a5   :  { %3574 = vpow2.f32 %v2751_v6 }
 0x3af   :  { %v3575_v7 = vpop.eup %3574 }
 0x3b0   :  { %v449_v10 = vadd.f32 1.0, %v3575_v7 }
 0x3b2   :  { %3576 = vrcp.f32 %v449_v10 }
 0x3bc   :  { %v3577_v11 = vpop.eup %3576 }
 0x3bd   :  { %v465_v19 = vsub.f32 1.0, %v3577_v11  ;;  %v473_v21 = vmul.f32 %v3577_v11, %v471_v18 }
 0x415   :  { %v456_v12 = vpop.permute.xlu1 %455 }
 0x416   :  { %v458_v13 = vmul.f32 %v3577_v11, %v456_v12 }
 0x418   :  { %460 = vrot.lane.b32.xlu0 %v458_v13, %s3715_s19 }
 0x48a   :  { %v461_v14 = vpop.permute.xlu0 %460 }
 0x48b   :  { %v463_v16 = vadd.f32 %v461_v14, %v3897_v38 }
 0x48d   :  { %3578 = vtanh.f32 %v463_v16 }
 0x497   :  { %v3579_v17 = vpop.eup %3578 }
 0x498   :  { %467 = vrot.lane.b32.xlu1 %v3579_v17, %s3716_s4 }
 0x50a   :  { %v468_v20 = vpop.permute.xlu1 %467 }
 0x50b   :  { %v470_v22 = vmul.f32 %v468_v20, %v465_v19 }
 0x50d   :  { %v474_v23 = vadd.f32 %v473_v21, %v470_v22 }
 0x50f   :  { %v476_v24 = vrot.slane %v474_v23, 2  ;;  %v650_v46 = vrot.slane %v474_v23, 6 }
 0x511   :  { %477 = vrot.lane.b32.xlu0 %v476_v24, %s3716_s4 }
 0x583   :  { %v478_v25 = vpop.permute.xlu0 %477 }
 0x584   :  { %3036 = vmatmul.mubr.msk.f32.vlgmr.msra.gmra.mrb[6].mxu1 %vm193_vm3, %v478_v25  ;;  %3047 = vmatmul.mubr.msk.f32.vlgmr.msra.gmra.mrb[2].mxu0 %vm193_vm3, %v478_v25 }
 0x585   :  { %3395 = vmatpush3.bf16.msra.mxu1 %v3911_v51  ;;  %3401 = vmatpush3.bf16.msra.mxu0 %v3825_v9 }
 0x586   :  { %3396 = vmatprep.subr.bf16.mxu1 %v3712_v3  ;;  %3402 = vmatprep.subr.bf16.mxu0 %v3712_v3 }
 0x587   :  { %3068 = vmatprep.mubr.msk.f32.mxu0 %vm3713_vm0, %v3714_v8  ;;  %3057 = vmatprep.mubr.msk.f32.mxu1 %vm3713_vm0, %v3714_v8 }
 0x589   :  { %3398 = vmatpush3.bf16.msra.mxu1 %v3917_v53  ;;  %3404 = vmatpush3.bf16.msra.mxu0 %v3840_v15 }
 0x58a   :  { %3405 = vmatprep.subr.bf16.mxu1 %v3712_v3  ;;  %3411 = vmatprep.subr.bf16.mxu0 %v3712_v3 }
 0x657   :  { %v3961_v26 = vpop.f32.mrb[6].mxu1  ;;  %v617_v27 = vpop.f32.mrb[2].mxu0 }
 0x658   :  { %v631_v28 = vadd.f32 %v617_v27, %v3888_v30  ;;  %v3037_v29 = vpop.f32.mrb[7].mxu1  ;;  %v3048_v31 = vpop.f32.mrb[3].mxu0  ;;  %v622_v33 = vrot.slane %v617_v27, 4 }
 0x65a   :  { %v633_v32 = vrot.slane %v631_v28, 4  ;;  %v624_v34 = vadd.f32 %v622_v33, %v3897_v38 }
 0x65c   :  { %634 = vrot.lane.b32.xlu1 %v633_v32, %s3715_s19  ;;  %v2754_v35 = vmul.f32 -1.442695, %v624_v34 }
 0x65e   :  { %3580 = vpow2.f32 %v2754_v35 }
 0x668   :  { %v3581_v37 = vpop.eup %3580 }
 0x669   :  { %v628_v39 = vadd.f32 1.0, %v3581_v37 }
 0x66b   :  { %3582 = vrcp.f32 %v628_v39 }
 0x675   :  { %v3583_v40 = vpop.eup %3582 }
 0x676   :  { %v644_v47 = vsub.f32 1.0, %v3583_v40  ;;  %v652_v49 = vmul.f32 %v3583_v40, %v650_v46 }
 0x6ce   :  { %v635_v41 = vpop.permute.xlu1 %634 }
 0x6cf   :  { %v637_v42 = vmul.f32 %v3583_v40, %v635_v41 }
 0x6d1   :  { %639 = vrot.lane.b32.xlu0 %v637_v42, %s3715_s19 }
 0x743   :  { %v640_v43 = vpop.permute.xlu0 %639 }
 0x744   :  { %v642_v44 = vadd.f32 %v640_v43, %v3897_v38 }
 0x746   :  { %3584 = vtanh.f32 %v642_v44 }
 0x750   :  { %v3585_v45 = vpop.eup %3584 }
 0x751   :  { %646 = vrot.lane.b32.xlu1 %v3585_v45, %s3716_s4 }
 0x7c3   :  { %v647_v48 = vpop.permute.xlu1 %646 }
 0x7c4   :  { %v649_v50 = vmul.f32 %v647_v48, %v644_v47 }
 0x7c6   :  { %v653_v52 = vadd.f32 %v652_v49, %v649_v50 }
 0x7c8   :  { %v655_v54 = vrot.slane %v653_v52, 4  ;;  %v829_v13 = vrot.slane %v653_v52, 6 }
 0x7ca   :  { %656 = vrot.lane.b32.xlu0 %v655_v54, %s3716_s4 }
 0x83c   :  { %v657_v55 = vpop.permute.xlu0 %656 }
 0x83d   :  { %3058 = vmatmul.mubr.msk.f32.vlgmr.msra.gmra.mrb[8].mxu1 %vm193_vm3, %v657_v55  ;;  %3069 = vmatmul.mubr.msk.f32.vlgmr.msra.gmra.mrb[4].mxu0 %vm193_vm3, %v657_v55 }
 0x83e   :  { %3407 = vmatpush3.bf16.msra.mxu1 %v3911_v51  ;;  %3413 = vmatpush3.bf16.msra.mxu0 %v3825_v9 }
 0x83f   :  { %3408 = vmatprep.subr.bf16.mxu1 %v3712_v3  ;;  %3414 = vmatprep.subr.bf16.mxu0 %v3712_v3 }
 0x840   :  { %3090 = vmatprep.mubr.msk.f32.mxu0 %vm3713_vm0, %v3714_v8  ;;  %3079 = vmatprep.mubr.msk.f32.mxu1 %vm3713_vm0, %v3714_v8 }
 0x842   :  { %3410 = vmatpush3.bf16.msra.mxu1 %v3917_v53  ;;  %3416 = vmatpush3.bf16.msra.mxu0 %v3840_v15 }
 0x843   :  { %3417 = vmatprep.subr.bf16.mxu1 %v3712_v3  ;;  %3423 = vmatprep.subr.bf16.mxu0 %v3712_v3 }
 0x910   :  { %v3984_v56 = vpop.f32.mrb[8].mxu1  ;;  %v796_v57 = vpop.f32.mrb[4].mxu0 }
 0x911   :  { %v810_v58 = vadd.f32 %v796_v57, %v3888_v30  ;;  %v3059_v59 = vpop.f32.mrb[9].mxu1  ;;  %v3070_v60 = vpop.f32.mrb[5].mxu0  ;;  %v801_v63 = vrot.slane %v796_v57, 2 }
 0x913   :  { %v812_v62 = vrot.slane %v810_v58, 2  ;;  %v803_v0 = vadd.f32 %v801_v63, %v3897_v38 }
 0x915   :  { %813 = vrot.lane.b32.xlu1 %v812_v62, %s3715_s19  ;;  %v2757_v1 = vmul.f32 -1.442695, %v803_v0 }
 0x917   :  { %3586 = vpow2.f32 %v2757_v1 }
 0x921   :  { %v3587_v2 = vpop.eup %3586 }
 0x922   :  { %v807_v4 = vadd.f32 1.0, %v3587_v2 }
 0x924   :  { %3588 = vrcp.f32 %v807_v4 }
 0x92e   :  { %v3589_v5 = vpop.eup %3588 }
 0x92f   :  { %v823_v14 = vsub.f32 1.0, %v3589_v5  ;;  %v831_v17 = vmul.f32 %v3589_v5, %v829_v13 }
 0x987   :  { %v814_v6 = vpop.permute.xlu1 %813 }
 0x988   :  { %v816_v7 = vmul.f32 %v3589_v5, %v814_v6 }
 0x98a   :  { %818 = vrot.lane.b32.xlu0 %v816_v7, %s3715_s19 }
 0x9fc   :  { %v819_v10 = vpop.permute.xlu0 %818 }
 0x9fd   :  { %v821_v11 = vadd.f32 %v819_v10, %v3897_v38 }
 0x9ff   :  { %3590 = vtanh.f32 %v821_v11 }
 0xa09   :  { %v3591_v12 = vpop.eup %3590 }
 0xa0a   :  { %825 = vrot.lane.b32.xlu1 %v3591_v12, %s3716_s4 }
 0xa7c   :  { %v826_v16 = vpop.permute.xlu1 %825 }
 0xa7d   :  { %v828_v18 = vmul.f32 %v826_v16, %v823_v14 }
 0xa7f   :  { %v832_v19 = vadd.f32 %v831_v17, %v828_v18 }
 0xa81   :  { %v834_v20 = vrot.slane %v832_v19, 6 }
 0xa83   :  { %835 = vrot.lane.b32.xlu0 %v834_v20, %s3716_s4 }
 0xaf5   :  { %v836_v21 = vpop.permute.xlu0 %835 }
 0xaf6   :  { %3080 = vmatmul.mubr.msk.f32.vlgmr.msra.gmra.mrb[10].mxu1 %vm193_vm3, %v836_v21  ;;  %3091 = vmatmul.mubr.msk.f32.vlgmr.msra.gmra.mrb[6].mxu0 %vm193_vm3, %v836_v21 }
 0xaf7   :  { %3419 = vmatpush3.bf16.msra.mxu1 %v3911_v51  ;;  %3425 = vmatpush3.bf16.msra.mxu0 %v3825_v9 }
 0xaf8   :  { %3420 = vmatprep.subr.bf16.mxu1 %v3712_v3  ;;  %3426 = vmatprep.subr.bf16.mxu0 %v3712_v3 }
 0xaf9   :  { %3112 = vmatprep.mubr.msk.f32.mxu0 %vm3713_vm0, %v3714_v8  ;;  %3101 = vmatprep.mubr.msk.f32.mxu1 %vm3713_vm0, %v3714_v8 }
 0xafb   :  { %3422 = vmatpush3.bf16.msra.mxu1 %v3917_v53  ;;  %3428 = vmatpush3.bf16.msra.mxu0 %v3840_v15 }
 0xafc   :  { %3429 = vmatprep.subr.bf16.mxu1 %v3712_v3  ;;  %3435 = vmatprep.subr.bf16.mxu0 %v3712_v3 }
 0xbc9   :  { %v4007_v38 = vpop.f32.mrb[10].mxu1  ;;  %v975_v22 = vpop.f32.mrb[6].mxu0 }
 0xbca   :  { %v986_v23 = vadd.f32 %v975_v22, %v3888_v30  ;;  %v3081_v24 = vpop.f32.mrb[11].mxu1  ;;  %v3092_v25 = vpop.f32.mrb[7].mxu0  ;;  %v979_v27 = vadd.f32 %v975_v22, %v3895_v36 }
 0xbcc   :  { %988 = vrot.lane.b32.xlu1 %v986_v23, %s3715_s19  ;;  %v2760_v28 = vmul.f32 -1.442695, %v979_v27 }
 0xbce   :  { %3592 = vpow2.f32 %v2760_v28 }
 0xbd8   :  { %v3593_v29 = vpop.eup %3592 }
 0xbd9   :  { %v983_v31 = vadd.f32 1.0, %v3593_v29 }
 0xbdb   :  { %3594 = vrcp.f32 %v983_v31 }
 0xbe5   :  { %v3595_v32 = vpop.eup %3594 }
 0xbe6   :  { %v998_v40 = vsub.f32 1.0, %v3595_v32  ;;  %v1005_v42 = vmul.f32 %v3595_v32, %v834_v20 }
 0xc3e   :  { %v989_v33 = vpop.permute.xlu1 %988 }
 0xc3f   :  { %v991_v34 = vmul.f32 %v3595_v32, %v989_v33 }
 0xc41   :  { %993 = vrot.lane.b32.xlu0 %v991_v34, %s3715_s19 }
 0xcb3   :  { %v994_v35 = vpop.permute.xlu0 %993 }
 0xcb4   :  { %v996_v37 = vadd.f32 %v994_v35, %v3895_v36 }
 0xcb6   :  { %3596 = vtanh.f32 %v996_v37 }
 0xcc0   :  { %v3597_v39 = vpop.eup %3596 }
 0xcc1   :  { %1000 = vrot.lane.b32.xlu1 %v3597_v39, %s3716_s4 }
 0xd33   :  { %v1001_v41 = vpop.permute.xlu1 %1000 }
 0xd34   :  { %v1003_v43 = vmul.f32 %v1001_v41, %v998_v40 }
 0xd36   :  { %v1006_v44 = vadd.f32 %v1005_v42, %v1003_v43 }
 0xd38   :  { %1008 = vrot.lane.b32.xlu0 %v1006_v44, %s3716_s4  ;;  %v1181_v4 = vrot.slane %v1006_v44, 6 }
 0xdaa   :  { %v1009_v45 = vpop.permute.xlu0 %1008 }
 0xdab   :  { %3102 = vmatmul.mubr.msk.f32.vlgmr.msra.gmra.mrb[12].mxu1 %vm193_vm3, %v1009_v45  ;;  %3113 = vmatmul.mubr.msk.f32.vlgmr.msra.gmra.mrb[8].mxu0 %vm193_vm3, %v1009_v45 }
 0xdac   :  { %3431 = vmatpush3.bf16.msra.mxu1 %v3911_v51  ;;  %3437 = vmatpush3.bf16.msra.mxu0 %v3825_v9 }
 0xdad   :  { %3432 = vmatprep.subr.bf16.mxu1 %v3712_v3  ;;  %3438 = vmatprep.subr.bf16.mxu0 %v3712_v3 }
 0xdae   :  { %3134 = vmatprep.mubr.msk.f32.mxu0 %vm3713_vm0, %v3714_v8  ;;  %3123 = vmatprep.mubr.msk.f32.mxu1 %vm3713_vm0, %v3714_v8 }
 0xdb0   :  { %3434 = vmatpush3.bf16.msra.mxu1 %v3917_v53  ;;  %3440 = vmatpush3.bf16.msra.mxu0 %v3840_v15 }
 0xdb1   :  { %3441 = vmatprep.subr.bf16.mxu1 %v3712_v3  ;;  %3447 = vmatprep.subr.bf16.mxu0 %v3712_v3 }
 0xe7e   :  { %v4030_v46 = vpop.f32.mrb[12].mxu1  ;;  %v1148_v47 = vpop.f32.mrb[8].mxu0 }
 0xe7f   :  { %v1162_v48 = vadd.f32 %v1148_v47, %v3888_v30  ;;  %v3103_v49 = vpop.f32.mrb[13].mxu1  ;;  %v3114_v50 = vpop.f32.mrb[9].mxu0  ;;  %v1153_v54 = vrot.slane %v1148_v47, 6 }
 0xe81   :  { %v1164_v52 = vrot.slane %v1162_v48, 6  ;;  %v1155_v55 = vadd.f32 %v1153_v54, %v3895_v36 }
 0xe83   :  { %1165 = vrot.lane.b32.xlu1 %v1164_v52, %s3715_s19  ;;  %v2763_v57 = vmul.f32 -1.442695, %v1155_v55 }
 0xe85   :  { %3598 = vpow2.f32 %v2763_v57 }
 0xe8f   :  { %v3599_v58 = vpop.eup %3598 }
 0xe90   :  { %v1159_v59 = vadd.f32 1.0, %v3599_v58 }
 0xe92   :  { %3600 = vrcp.f32 %v1159_v59  ;;  %v58_v59 = vld [vmem:[%s4391_s6] sm:$0xff] }
 0xe9c   :  { %v3601_v60 = vpop.eup %3600 }
 0xe9d   :  { %v1175_v5 = vsub.f32 1.0, %v3601_v60  ;;  %v1183_v7 = vmul.f32 %v3601_v60, %v1181_v4 }
 0xef5   :  { %v1166_v62 = vpop.permute.xlu1 %1165 }
 0xef6   :  { %v1168_v63 = vmul.f32 %v3601_v60, %v1166_v62  ;;  %v59_v60 = vld [vmem:[%s4391_s6 + $0x8] sm:$0xff]  ;;  %v60_v62 = vld [vmem:[%s4391_s6 + $0x10] sm:$0xff] }
 0xef8   :  { %1170 = vrot.lane.b32.xlu0 %v1168_v63, %s3715_s19  ;;  %v4088_v63 = vpack.c.bf16 %v59_v60, %v58_v59 }
 0xf6a   :  { %v1171_v0 = vpop.permute.xlu0 %1170 }
 0xf6b   :  { %v1173_v1 = vadd.f32 %v1171_v0, %v3895_v36  ;;  %v61_v0 = vld [vmem:[%s4391_s6 + $0x18] sm:$0xff] }
 0xf6d   :  { %3602 = vtanh.f32 %v1173_v1 }
 0xf77   :  { %v3603_v2 = vpop.eup %3602 }
 0xf78   :  { %1177 = vrot.lane.b32.xlu1 %v3603_v2, %s3716_s4  ;;  %v2742_v2 = vld [vmem:[%s4393_s8] ss:$0 sm:$0xff] }
 0xfea   :  { %v1178_v6 = vpop.permute.xlu1 %1177 }
 0xfeb   :  { %v1180_v10 = vmul.f32 %v1178_v6, %v1175_v5 }
 0xfed   :  { %v1184_v11 = vadd.f32 %v1183_v7, %v1180_v10 }
 0xfef   :  { %v1186_v12 = vrot.slane %v1184_v11, 2  ;;  %v1360_v32 = vrot.slane %v1184_v11, 6 }
 0xff1   :  { %1187 = vrot.lane.b32.xlu0 %v1186_v12, %s3716_s4 }
0x1063   :  { %v1188_v13 = vpop.permute.xlu0 %1187 }
0x1064   :  { %3124 = vmatmul.mubr.msk.f32.vlgmr.msra.gmra.mrb[14].mxu1 %vm193_vm3, %v1188_v13  ;;  %3135 = vmatmul.mubr.msk.f32.vlgmr.msra.gmra.mrb[10].mxu0 %vm193_vm3, %v1188_v13 }
0x1065   :  { %3443 = vmatpush3.bf16.msra.mxu1 %v3911_v51  ;;  %3449 = vmatpush3.bf16.msra.mxu0 %v3825_v9 }
0x1066   :  { %3444 = vmatprep.subr.bf16.mxu1 %v3712_v3  ;;  %3450 = vmatprep.subr.bf16.mxu0 %v3712_v3 }
0x1067   :  { %3156 = vmatprep.mubr.msk.f32.mxu0 %vm3713_vm0, %v3714_v8  ;;  %3145 = vmatprep.mubr.msk.f32.mxu1 %vm3713_vm0, %v3714_v8 }
0x1069   :  { %3446 = vmatpush3.bf16.msra.mxu1 %v3917_v53  ;;  %3452 = vmatpush3.bf16.msra.mxu0 %v3840_v15 }
0x106a   :  { %3453 = vmatprep.subr.bf16.mxu1 %v3712_v3  ;;  %3459 = vmatprep.subr.bf16.mxu0 %v3712_v3 }
0x1137   :  { %v4053_v14 = vpop.f32.mrb[14].mxu1  ;;  %v1327_v9 = vpop.f32.mrb[10].mxu0 }
0x1138   :  { %v1341_v16 = vadd.f32 %v1327_v9, %v3888_v30  ;;  %v3125_v17 = vpop.f32.mrb[15].mxu1  ;;  %v3136_v18 = vpop.f32.mrb[11].mxu0  ;;  %v1332_v20 = vrot.slane %v1327_v9, 4 }
0x113a   :  { %v1343_v19 = vrot.slane %v1341_v16, 4  ;;  %v1334_v21 = vadd.f32 %v1332_v20, %v3895_v36 }
0x113c   :  { %1344 = vrot.lane.b32.xlu1 %v1343_v19, %s3715_s19  ;;  %v2766_v22 = vmul.f32 -1.442695, %v1334_v21  ;;  %v4128_v21 = vld [vmem:[%s4392_s7] ss:$0 sm:$0xff] }
0x113e   :  { %3604 = vpow2.f32 %v2766_v22  ;;  %v369_v22 = vadd.f32 %v4128_v21, %v3938_v61 }
0x1148   :  { %v3605_v15 = vpop.eup %3604 }
0x1149   :  { %v1338_v23 = vadd.f32 1.0, %v3605_v15 }
0x114b   :  { %3606 = vrcp.f32 %v1338_v23 }
0x1155   :  { %v3607_v24 = vpop.eup %3606 }
0x1156   :  { %v1354_v33 = vsub.f32 1.0, %v3607_v24  ;;  %v1362_v35 = vmul.f32 %v3607_v24, %v1360_v32 }
0x11ae   :  { %v1345_v25 = vpop.permute.xlu1 %1344 }
0x11af   :  { %v1347_v27 = vmul.f32 %v3607_v24, %v1345_v25 }
0x11b1   :  { %1349 = vrot.lane.b32.xlu0 %v1347_v27, %s3715_s19 }
0x1223   :  { %v1350_v28 = vpop.permute.xlu0 %1349 }
0x1224   :  { %v1352_v29 = vadd.f32 %v1350_v28, %v3895_v36 }
0x1226   :  { %3608 = vtanh.f32 %v1352_v29 }
0x1230   :  { %v3609_v31 = vpop.eup %3608 }
0x1231   :  { %1356 = vrot.lane.b32.xlu1 %v3609_v31, %s3716_s4 }
0x12a3   :  { %v1357_v34 = vpop.permute.xlu1 %1356 }
0x12a4   :  { %v1359_v37 = vmul.f32 %v1357_v34, %v1354_v33 }
0x12a6   :  { %v1363_v39 = vadd.f32 %v1362_v35, %v1359_v37 }
0x12a8   :  { %v1365_v40 = vrot.slane %v1363_v39, 4  ;;  %v1539_v4 = vrot.slane %v1363_v39, 6 }
0x12aa   :  { %1366 = vrot.lane.b32.xlu0 %v1365_v40, %s3716_s4 }
0x131c   :  { %v1367_v41 = vpop.permute.xlu0 %1366 }
0x131d   :  { %3146 = vmatmul.mubr.msk.f32.vlgmr.msra.gmra.mrb[16].mxu1 %vm193_vm3, %v1367_v41  ;;  %3157 = vmatmul.mubr.msk.f32.vlgmr.msra.gmra.mrb[12].mxu0 %vm193_vm3, %v1367_v41 }
0x131e   :  { %3455 = vmatpush3.bf16.msra.mxu1 %v3911_v51  ;;  %3178 = vmatprep.mubr.msk.f32.mxu0 %vm3713_vm0, %v3714_v8 }
0x131f   :  { %3456 = vmatprep.subr.bf16.mxu1 %v3712_v3  ;;  %3167 = vmatprep.mubr.msk.f32.mxu1 %vm3713_vm0, %v3714_v8 }
0x1320   :  { %3461 = vmatpush3.bf16.msra.mxu0 %v4088_v63 }
0x1321   :  { %3462 = vmatprep.subr.bf16.mxu0 %v3712_v3 }
0x1322   :  { %3458 = vmatpush3.bf16.msra.mxu1 %v3917_v53 }
0x1323   :  { %3465 = vmatprep.subr.bf16.mxu1 %v3712_v3 }
0x13f0   :  { %v4072_v42 = vpop.f32.mrb[16].mxu1  ;;  %v1506_v43 = vpop.f32.mrb[12].mxu0 }
0x13f1   :  { %v1520_v44 = vadd.f32 %v1506_v43, %v3888_v30  ;;  %v3147_v45 = vpop.f32.mrb[17].mxu1  ;;  %v3158_v47 = vpop.f32.mrb[13].mxu0  ;;  %v1511_v48 = vrot.slane %v1506_v43, 2 }
0x13f2   :  { %v548_v45 = vadd.f32 %v4128_v21, %v3961_v26 }
0x13f3   :  { %v1522_v51 = vrot.slane %v1520_v44, 2  ;;  %v1513_v49 = vadd.f32 %v1511_v48, %v3895_v36 }
0x13f5   :  { %1523 = vrot.lane.b32.xlu1 %v1522_v51, %s3715_s19  ;;  %v2769_v50 = vmul.f32 -1.442695, %v1513_v49 }
0x13f7   :  { %3610 = vpow2.f32 %v2769_v50 }
0x1401   :  { %v3611_v52 = vpop.eup %3610 }
0x1402   :  { %v1517_v54 = vadd.f32 1.0, %v3611_v52 }
0x1404   :  { %3612 = vrcp.f32 %v1517_v54 }
0x140e   :  { %v3613_v53 = vpop.eup %3612 }
0x140f   :  { %v1533_v5 = vsub.f32 1.0, %v3613_v53  ;;  %v1541_v7 = vmul.f32 %v3613_v53, %v1539_v4  ;;  %v727_v4 = vadd.f32 %v4128_v21, %v3984_v56 }
0x1467   :  { %v1524_v55 = vpop.permute.xlu1 %1523 }
0x1468   :  { %v1526_v57 = vmul.f32 %v3613_v53, %v1524_v55 }
0x146a   :  { %1528 = vrot.lane.b32.xlu0 %v1526_v57, %s3715_s19 }
0x14dc   :  { %v1529_v58 = vpop.permute.xlu0 %1528 }
0x14dd   :  { %v1531_v30 = vadd.f32 %v1529_v58, %v3895_v36  ;;  %v4094_v36 = vpack.c.bf16 %v61_v0, %v60_v62 }
0x14df   :  { %3614 = vtanh.f32 %v1531_v30  ;;  %3464 = vmatpush3.bf16.msra.mxu0 %v4094_v36 }
0x14e0   :  { %3471 = vmatprep.subr.bf16.mxu0 %v3712_v3 }
0x14e9   :  { %v3615_v1 = vpop.eup %3614 }
0x14ea   :  { %1535 = vrot.lane.b32.xlu1 %v3615_v1, %s3716_s4 }
0x14ee   :  { %1696 = vrot.lane.b32.xlu1 %v2742_v2, %s3715_s19 }
0x155c   :  { %v1536_v6 = vpop.permute.xlu1 %1535 }
0x155d   :  { %v1538_v10 = vmul.f32 %v1536_v6, %v1533_v5 }
0x155f   :  { %v1542_v11 = vadd.f32 %v1541_v7, %v1538_v10 }
0x1560   :  { %v4119_v9 = vpop.permute.xlu1 %1696 }
0x1561   :  { %v1544_v12 = vrot.slane %v1542_v11, 6 }
0x1563   :  { %1545 = vrot.lane.b32.xlu0 %v1544_v12, %s3716_s4 }
0x15d5   :  { %v1546_v13 = vpop.permute.xlu0 %1545 }
0x15d6   :  { %3168 = vmatmul.mubr.msk.f32.vlgmr.msra.gmra.mrb[18].mxu1 %vm193_vm3, %v1546_v13  ;;  %3179 = vmatmul.mubr.msk.f32.vlgmr.msra.gmra.mrb[14].mxu0 %vm193_vm3, %v1546_v13 }
0x15d7   :  { %3467 = vmatpush3.bf16.msra.mxu1 %v4088_v63  ;;  %3189 = vmatprep.mubr.msk.f32.mxu1 %vm3713_vm0, %v3714_v8 }
0x15d8   :  { %3468 = vmatprep.subr.bf16.mxu1 %v3712_v3  ;;  %3473 = vmatpush3.bf16.msra.mxu0 %v4088_v63 }
0x15d9   :  { %3474 = vmatprep.subr.bf16.mxu0 %v3712_v3  ;;  %3200 = vmatprep.mubr.msk.f32.mxu0 %vm3713_vm0, %v3714_v8 }
0x15db   :  { %3470 = vmatpush3.bf16.msra.mxu1 %v4094_v36 }
0x15dc   :  { %3476 = vmatpush3.bf16.msra.mxu0 %v4094_v36  ;;  %3477 = vmatprep.subr.bf16.mxu1 %v3712_v3 }
0x15dd   :  { %3483 = vmatprep.subr.bf16.mxu0 %v3712_v3 }
0x16a9   :  { %v4121_v16 = vpop.f32.mrb[18].mxu1  ;;  %v1685_v17 = vpop.f32.mrb[14].mxu0 }
0x16aa   :  { %v1699_v18 = vadd.f32 %v4119_v9, %v1685_v17  ;;  %v3169_v19 = vpop.f32.mrb[19].mxu1  ;;  %v3180_v20 = vpop.f32.mrb[15].mxu0  ;;  %v1689_v15 = vadd.f32 %v1685_v17, %v369_v22 }
0x16ac   :  { %1701 = vrot.lane.b32.xlu0 %v1699_v18, %s3715_s19  ;;  %v2772_v23 = vmul.f32 -1.442695, %v1689_v15 }
0x16ae   :  { %3616 = vpow2.f32 %v2772_v23 }
0x16b8   :  { %v3617_v24 = vpop.eup %3616 }
0x16b9   :  { %v1693_v25 = vadd.f32 1.0, %v3617_v24 }
0x16bb   :  { %3618 = vrcp.f32 %v1693_v25 }
0x16c5   :  { %v3619_v27 = vpop.eup %3618 }
0x16c6   :  { %v1711_v34 = vsub.f32 1.0, %v3619_v27  ;;  %v1718_v61 = vmul.f32 %v3619_v27, %v1544_v12 }
0x171e   :  { %v1702_v28 = vpop.permute.xlu0 %1701 }
0x171f   :  { %v1704_v29 = vmul.f32 %v3619_v27, %v1702_v28 }
0x1721   :  { %1706 = vrot.lane.b32.xlu1 %v1704_v29, %s3715_s19  ;;  %v906_v29 = vadd.f32 %v4128_v21, %v4007_v38 }
0x1793   :  { %v1707_v31 = vpop.permute.xlu1 %1706 }
0x1794   :  { %v1709_v32 = vadd.f32 %v1707_v31, %v369_v22 }
0x1796   :  { %3620 = vtanh.f32 %v1709_v32 }
0x17a0   :  { %v3621_v33 = vpop.eup %3620 }
0x17a1   :  { %1713 = vrot.lane.b32.xlu0 %v3621_v33, %s3716_s4 }
0x1813   :  { %v1714_v35 = vpop.permute.xlu0 %1713 }
0x1814   :  { %v1716_v37 = vmul.f32 %v1714_v35, %v1711_v34 }
0x1816   :  { %v1719_v39 = vadd.f32 %v1718_v61, %v1716_v37 }
0x1818   :  { %1721 = vrot.lane.b32.xlu1 %v1719_v39, %s3716_s4 }
0x188a   :  { %v1722_v40 = vpop.permute.xlu1 %1721 }
0x188b   :  { %3190 = vmatmul.mubr.msk.f32.vlgmr.msra.gmra.mrb[20].mxu1 %vm193_vm3, %v1722_v40 }
0x188c   :  { %3479 = vmatpush3.bf16.msra.mxu1 %v4088_v63  ;;  %3211 = vmatprep.mubr.msk.f32.mxu1 %vm3713_vm0, %v3714_v8 }
0x188d   :  { %3480 = vmatprep.subr.bf16.mxu1 %v3712_v3 }
0x1890   :  { %3482 = vmatpush3.bf16.msra.mxu1 %v4094_v36 }
0x1891   :  { %3489 = vmatprep.subr.bf16.mxu1 %v3712_v3 }
0x195e   :  { %v1791_v41 = vpop.f32.mrb[20].mxu1 }
0x195f   :  { %v1802_v43 = vadd.f32 %v1791_v41, %v4119_v9  ;;  %v3191_v44 = vpop.f32.mrb[21].mxu1  ;;  %v1795_v47 = vadd.f32 %v1791_v41, %v548_v45 }
0x1961   :  { %1804 = vrot.lane.b32.xlu0 %v1802_v43, %s3715_s19  ;;  %v2774_v51 = vmul.f32 -1.442695, %v1795_v47 }
0x1963   :  { %3622 = vpow2.f32 %v2774_v51 }
0x196d   :  { %v3623_v48 = vpop.eup %3622 }
0x196e   :  { %v1799_v49 = vadd.f32 1.0, %v3623_v48 }
0x1970   :  { %3624 = vrcp.f32 %v1799_v49 }
0x197a   :  { %v3625_v50 = vpop.eup %3624 }
0x197b   :  { %v1814_v58 = vsub.f32 1.0, %v3625_v50  ;;  %v1820_v26 = vmul.f32 %v3625_v50, %v1719_v39 }
0x19d3   :  { %v1805_v52 = vpop.permute.xlu0 %1804 }
0x19d4   :  { %v1807_v54 = vmul.f32 %v3625_v50, %v1805_v52  ;;  %v1079_v52 = vadd.f32 %v4128_v21, %v4030_v46 }
0x19d6   :  { %1809 = vrot.lane.b32.xlu1 %v1807_v54, %s3715_s19 }
0x1a48   :  { %v1810_v53 = vpop.permute.xlu1 %1809 }
0x1a49   :  { %v1812_v55 = vadd.f32 %v1810_v53, %v548_v45 }
0x1a4b   :  { %3626 = vtanh.f32 %v1812_v55 }
0x1a55   :  { %v3627_v57 = vpop.eup %3626 }
0x1a56   :  { %1816 = vrot.lane.b32.xlu0 %v3627_v57, %s3716_s4 }
0x1ac8   :  { %v1817_v30 = vpop.permute.xlu0 %1816 }
0x1ac9   :  { %v1819_v59 = vmul.f32 %v1817_v30, %v1814_v58 }
0x1acb   :  { %v1821_v60 = vadd.f32 %v1820_v26, %v1819_v59 }
0x1acd   :  { %1823 = vrot.lane.b32.xlu1 %v1821_v60, %s3716_s4 }
0x1b3f   :  { %v1824_v62 = vpop.permute.xlu1 %1823 }
0x1b40   :  { %3201 = vmatmul.mubr.msk.f32.vlgmr.msra.gmra.mrb[16].mxu0 %vm193_vm3, %v1824_v62 }
0x1b41   :  { %3485 = vmatpush3.bf16.msra.mxu0 %v4088_v63  ;;  %3222 = vmatprep.mubr.msk.f32.mxu0 %vm3713_vm0, %v3714_v8 }
0x1b42   :  { %3486 = vmatprep.subr.bf16.mxu0 %v3712_v3 }
0x1b45   :  { %3488 = vmatpush3.bf16.msra.mxu0 %v4094_v36 }
0x1b46   :  { %3495 = vmatprep.subr.bf16.mxu0 %v3712_v3 }
0x1c13   :  { %v1893_v0 = vpop.f32.mrb[16].mxu0 }
0x1c14   :  { %v1904_v1 = vadd.f32 %v1893_v0, %v4119_v9  ;;  %v3202_v2 = vpop.f32.mrb[17].mxu0  ;;  %v1897_v5 = vadd.f32 %v1893_v0, %v727_v4 }
0x1c16   :  { %1906 = vrot.lane.b32.xlu0 %v1904_v1, %s3715_s19  ;;  %v2776_v6 = vmul.f32 -1.442695, %v1897_v5 }
0x1c18   :  { %3628 = vpow2.f32 %v2776_v6 }
0x1c22   :  { %v3629_v7 = vpop.eup %3628 }
0x1c23   :  { %v1901_v10 = vadd.f32 1.0, %v3629_v7 }
0x1c25   :  { %3630 = vrcp.f32 %v1901_v10 }
0x1c2f   :  { %v3631_v11 = vpop.eup %3630 }
0x1c30   :  { %v1916_v20 = vsub.f32 1.0, %v3631_v11  ;;  %v1922_v56 = vmul.f32 %v3631_v11, %v1821_v60 }
0x1c88   :  { %v1907_v12 = vpop.permute.xlu0 %1906 }
0x1c89   :  { %v1909_v13 = vmul.f32 %v3631_v11, %v1907_v12  ;;  %v1258_v11 = vadd.f32 %v4128_v21, %v4053_v14 }
0x1c8b   :  { %1911 = vrot.lane.b32.xlu1 %v1909_v13, %s3715_s19 }
0x1cfd   :  { %v1912_v17 = vpop.permute.xlu1 %1911 }
0x1cfe   :  { %v1914_v18 = vadd.f32 %v1912_v17, %v727_v4 }
0x1d00   :  { %3632 = vtanh.f32 %v1914_v18 }
0x1d0a   :  { %v3633_v19 = vpop.eup %3632 }
0x1d0b   :  { %1918 = vrot.lane.b32.xlu0 %v3633_v19, %s3716_s4 }
0x1d7d   :  { %v1919_v22 = vpop.permute.xlu0 %1918 }
0x1d7e   :  { %v1921_v15 = vmul.f32 %v1919_v22, %v1916_v20 }
0x1d80   :  { %v1923_v23 = vadd.f32 %v1922_v56, %v1921_v15 }
0x1d82   :  { %1925 = vrot.lane.b32.xlu1 %v1923_v23, %s3716_s4 }
0x1df4   :  { %v1926_v24 = vpop.permute.xlu1 %1925 }
0x1df5   :  { %3212 = vmatmul.mubr.msk.f32.vlgmr.msra.gmra.mrb[22].mxu1 %vm193_vm3, %v1926_v24 }
0x1df6   :  { %3491 = vmatpush3.bf16.msra.mxu1 %v4088_v63  ;;  %3233 = vmatprep.mubr.msk.f32.mxu1 %vm3713_vm0, %v3714_v8 }
0x1df7   :  { %3492 = vmatprep.subr.bf16.mxu1 %v3712_v3 }
0x1dfa   :  { %3494 = vmatpush3.bf16.msra.mxu1 %v4094_v36 }
0x1dfb   :  { %3501 = vmatprep.subr.bf16.mxu1 %v3712_v3 }
0x1ec8   :  { %v1995_v25 = vpop.f32.mrb[22].mxu1 }
0x1ec9   :  { %v2006_v27 = vadd.f32 %v1995_v25, %v4119_v9  ;;  %v3213_v28 = vpop.f32.mrb[23].mxu1  ;;  %v1999_v31 = vadd.f32 %v1995_v25, %v906_v29 }
0x1ecb   :  { %2008 = vrot.lane.b32.xlu0 %v2006_v27, %s3715_s19  ;;  %v2778_v32 = vmul.f32 -1.442695, %v1999_v31 }
0x1ecd   :  { %3634 = vpow2.f32 %v2778_v32  ;;  %v1437_v32 = vadd.f32 %v4128_v21, %v4072_v42 }
0x1ed7   :  { %v3635_v33 = vpop.eup %3634 }
0x1ed8   :  { %v2003_v34 = vadd.f32 1.0, %v3635_v33 }
0x1eda   :  { %3636 = vrcp.f32 %v2003_v34 }
0x1ee4   :  { %v3637_v35 = vpop.eup %3636 }
0x1ee5   :  { %v2018_v43 = vsub.f32 1.0, %v3637_v35  ;;  %v2024_v38 = vmul.f32 %v3637_v35, %v1923_v23 }
0x1f3d   :  { %v2009_v61 = vpop.permute.xlu0 %2008 }
0x1f3e   :  { %v2011_v37 = vmul.f32 %v3637_v35, %v2009_v61 }
0x1f40   :  { %2013 = vrot.lane.b32.xlu1 %v2011_v37, %s3715_s19 }
0x1fb2   :  { %v2014_v39 = vpop.permute.xlu1 %2013 }
0x1fb3   :  { %v2016_v40 = vadd.f32 %v2014_v39, %v906_v29 }
0x1fb5   :  { %3638 = vtanh.f32 %v2016_v40 }
0x1fbf   :  { %v3639_v41 = vpop.eup %3638 }
0x1fc0   :  { %2020 = vrot.lane.b32.xlu0 %v3639_v41, %s3716_s4 }
0x2032   :  { %v2021_v44 = vpop.permute.xlu0 %2020 }
0x2033   :  { %v2023_v45 = vmul.f32 %v2021_v44, %v2018_v43 }
0x2035   :  { %v2025_v47 = vadd.f32 %v2024_v38, %v2023_v45 }
0x2037   :  { %2027 = vrot.lane.b32.xlu1 %v2025_v47, %s3716_s4 }
0x20a9   :  { %v2028_v51 = vpop.permute.xlu1 %2027 }
0x20aa   :  { %3223 = vmatmul.mubr.msk.f32.vlgmr.msra.gmra.mrb[18].mxu0 %vm193_vm3, %v2028_v51 }
0x20ab   :  { %3497 = vmatpush3.bf16.msra.mxu0 %v4088_v63  ;;  %3244 = vmatprep.mubr.msk.f32.mxu0 %vm3713_vm0, %v3714_v8 }
0x20ac   :  { %3498 = vmatprep.subr.bf16.mxu0 %v3712_v3 }
0x20af   :  { %3500 = vmatpush3.bf16.msra.mxu0 %v4094_v36 }
0x20b0   :  { %3507 = vmatprep.subr.bf16.mxu0 %v3712_v3 }
0x217d   :  { %v2097_v48 = vpop.f32.mrb[18].mxu0 }
0x217e   :  { %v2108_v49 = vadd.f32 %v2097_v48, %v4119_v9  ;;  %v3224_v50 = vpop.f32.mrb[19].mxu0  ;;  %v2101_v54 = vadd.f32 %v2097_v48, %v1079_v52 }
0x2180   :  { %2110 = vrot.lane.b32.xlu0 %v2108_v49, %s3715_s19  ;;  %v2780_v53 = vmul.f32 -1.442695, %v2101_v54  ;;  %v1616_v54 = vadd.f32 %v4128_v21, %v4121_v16  ;;  %v2441_v16 = vld [vmem:[%s4394_s9 + $0x8] sm:$0xff]  ;;  %v2442_v21 = vld [vmem:[%s4394_s9 + $0x10] sm:$0xff] }
0x2182   :  { %3640 = vpow2.f32 %v2780_v53 }
0x218c   :  { %v3641_v55 = vpop.eup %3640 }
0x218d   :  { %v2105_v57 = vadd.f32 1.0, %v3641_v55 }
0x218f   :  { %3642 = vrcp.f32 %v2105_v57 }
0x2199   :  { %v3643_v58 = vpop.eup %3642 }
0x219a   :  { %v2120_v0 = vsub.f32 1.0, %v3643_v58  ;;  %v2126_v46 = vmul.f32 %v3643_v58, %v2025_v47 }
0x21f2   :  { %v2111_v30 = vpop.permute.xlu0 %2110 }
0x21f3   :  { %v2113_v26 = vmul.f32 %v3643_v58, %v2111_v30 }
0x21f5   :  { %2115 = vrot.lane.b32.xlu1 %v2113_v26, %s3715_s19 }
0x2267   :  { %v2116_v59 = vpop.permute.xlu1 %2115 }
0x2268   :  { %v2118_v60 = vadd.f32 %v2116_v59, %v1079_v52 }
0x226a   :  { %3644 = vtanh.f32 %v2118_v60 }
0x2274   :  { %v3645_v62 = vpop.eup %3644 }
0x2275   :  { %2122 = vrot.lane.b32.xlu0 %v3645_v62, %s3716_s4 }
0x22e7   :  { %v2123_v1 = vpop.permute.xlu0 %2122 }
0x22e8   :  { %v2125_v2 = vmul.f32 %v2123_v1, %v2120_v0  ;;  %v2443_v1 = vld [vmem:[%s4394_s9 + $0x18] sm:$0xff] }
0x22ea   :  { %v2127_v4 = vadd.f32 %v2126_v46, %v2125_v2  ;;  %v3511_v46 = vpack.c.bf16 %v2443_v1, %v2442_v21 }
0x22ec   :  { %2129 = vrot.lane.b32.xlu1 %v2127_v4, %s3716_s4 }
0x235e   :  { %v2130_v5 = vpop.permute.xlu1 %2129 }
0x235f   :  { %3234 = vmatmul.mubr.msk.f32.vlgmr.msra.gmra.mrb[24].mxu1 %vm193_vm3, %v2130_v5  ;;  %v2525_v5 = vld [vmem:[%s4396_s11 + $0x8] sm:$0xff] }
0x2360   :  { %3503 = vmatpush3.bf16.msra.mxu1 %v4088_v63  ;;  %3255 = vmatprep.mubr.msk.f32.mxu1 %vm3713_vm0, %v3714_v8 }
0x2361   :  { %3504 = vmatprep.subr.bf16.mxu1 %v3712_v3 }
0x2364   :  { %3506 = vmatpush3.bf16.msra.mxu1 %v4094_v36 }
0x2365   :  { %3513 = vmatprep.subr.bf16.mxu1 %v3712_v3 }
0x2432   :  { %v2199_v6 = vpop.f32.mrb[24].mxu1 }
0x2433   :  { %v2210_v7 = vadd.f32 %v2199_v6, %v4119_v9  ;;  %v3235_v10 = vpop.f32.mrb[25].mxu1  ;;  %v2203_v12 = vadd.f32 %v2199_v6, %v1258_v11  ;;  %v2526_v6 = vld [vmem:[%s4396_s11 + $0x10] sm:$0xff] }
0x2434   :  { %v2527_v10 = vld [vmem:[%s4396_s11 + $0x18] sm:$0xff] }
0x2435   :  { %2212 = vrot.lane.b32.xlu0 %v2210_v7, %s3715_s19  ;;  %v2782_v63 = vmul.f32 -1.442695, %v2203_v12  ;;  %v2528_v12 = vld [vmem:[%s4396_s11 + $0x20] sm:$0xff] }
0x2437   :  { %3646 = vpow2.f32 %v2782_v63  ;;  %v2529_v63 = vld [vmem:[%s4396_s11 + $0x28] sm:$0xff] }
0x2441   :  { %v3647_v13 = vpop.eup %3646 }
0x2442   :  { %v2207_v17 = vadd.f32 1.0, %v3647_v13 }
0x2444   :  { %3648 = vrcp.f32 %v2207_v17  ;;  %v3520_v17 = vpack.c.bf16 %v2529_v63, %v2528_v12 }
0x244e   :  { %v3649_v18 = vpop.eup %3648 }
0x244f   :  { %v2222_v15 = vsub.f32 1.0, %v3649_v18  ;;  %v2228_v14 = vmul.f32 %v3649_v18, %v2127_v4  ;;  %v2524_v4 = vld [vmem:[%s4396_s11] sm:$0xff] }
0x2450   :  { %v3514_v7 = vpack.c.bf16 %v2525_v5, %v2524_v4 }
0x24a7   :  { %v2213_v19 = vpop.permute.xlu0 %2212 }
0x24a8   :  { %v2215_v36 = vmul.f32 %v3649_v18, %v2213_v19  ;;  %v2530_v19 = vld [vmem:[%s4396_s11 + $0x30] sm:$0xff] }
0x24aa   :  { %2217 = vrot.lane.b32.xlu1 %v2215_v36, %s3715_s19  ;;  %v2531_v36 = vld [vmem:[%s4396_s11 + $0x38] sm:$0xff] }
0x251c   :  { %v2218_v20 = vpop.permute.xlu1 %2217 }
0x251d   :  { %v2220_v22 = vadd.f32 %v2218_v20, %v1258_v11  ;;  %v3517_v11 = vpack.c.bf16 %v2527_v10, %v2526_v6 }
0x251f   :  { %3650 = vtanh.f32 %v2220_v22 }
0x2529   :  { %v3651_v56 = vpop.eup %3650 }
0x252a   :  { %2224 = vrot.lane.b32.xlu0 %v3651_v56, %s3716_s4 }
0x259c   :  { %v2225_v23 = vpop.permute.xlu0 %2224 }
0x259d   :  { %v2227_v24 = vmul.f32 %v2225_v23, %v2222_v15  ;;  %v3523_v15 = vpack.c.bf16 %v2531_v36, %v2530_v19  ;;  %v2532_v23 = vld [vmem:[%s4396_s11 + $0x40] sm:$0xff] }
0x259f   :  { %v2229_v25 = vadd.f32 %v2228_v14, %v2227_v24  ;;  %v2533_v14 = vld [vmem:[%s4396_s11 + $0x48] sm:$0xff] }
0x25a0   :  { %v3526_v24 = vpack.c.bf16 %v2533_v14, %v2532_v23 }
0x25a1   :  { %2231 = vrot.lane.b32.xlu1 %v2229_v25, %s3716_s4 }
0x2613   :  { %v2232_v27 = vpop.permute.xlu1 %2231 }
0x2614   :  { %3245 = vmatmul.mubr.msk.f32.vlgmr.msra.gmra.mrb[20].mxu0 %vm193_vm3, %v2232_v27  ;;  %v2535_v27 = vld [vmem:[%s4396_s11 + $0x58] sm:$0xff] }
0x2615   :  { %3266 = vmatprep.mubr.msk.f32.mxu0 %vm3713_vm0, %v3714_v8 }
0x26e7   :  { %v2301_v28 = vpop.f32.mrb[20].mxu0 }
0x26e8   :  { %v2312_v29 = vadd.f32 %v2301_v28, %v4119_v9  ;;  %v3246_v31 = vpop.f32.mrb[21].mxu0  ;;  %v2305_v33 = vadd.f32 %v2301_v28, %v1437_v32 }
0x26e9   :  { %v2537_v31 = vld [vmem:[%s4396_s11 + $0x68] sm:$0xff] }
0x26ea   :  { %2314 = vrot.lane.b32.xlu0 %v2312_v29, %s3715_s19  ;;  %v2784_v34 = vmul.f32 -1.442695, %v2305_v33  ;;  %v2536_v29 = vld [vmem:[%s4396_s11 + $0x60] sm:$0xff] }
0x26ec   :  { %3652 = vpow2.f32 %v2784_v34  ;;  %v2538_v34 = vld [vmem:[%s4396_s11 + $0x70] sm:$0xff] }
0x26f6   :  { %v3653_v35 = vpop.eup %3652 }
0x26f7   :  { %v2309_v61 = vadd.f32 1.0, %v3653_v35  ;;  %v2539_v35 = vld [vmem:[%s4396_s11 + $0x78] sm:$0xff] }
0x26f9   :  { %3654 = vrcp.f32 %v2309_v61  ;;  %v3535_v61 = vpack.c.bf16 %v2539_v35, %v2538_v34 }
0x2703   :  { %v3655_v37 = vpop.eup %3654 }
0x2704   :  { %v2324_v38 = vsub.f32 1.0, %v3655_v37  ;;  %v2330_v42 = vmul.f32 %v3655_v37, %v2229_v25  ;;  %v2534_v25 = vld [vmem:[%s4396_s11 + $0x50] sm:$0xff] }
0x2705   :  { %v3529_v28 = vpack.c.bf16 %v2535_v27, %v2534_v25 }
0x275c   :  { %v2315_v39 = vpop.permute.xlu0 %2314 }
0x275d   :  { %v2317_v40 = vmul.f32 %v3655_v37, %v2315_v39  ;;  %v2618_v37 = vld [vmem:[%s4398_s13] sm:$0xff]  ;;  %v2619_v39 = vld [vmem:[%s4398_s13 + $0x8] sm:$0xff] }
0x275f   :  { %2319 = vrot.lane.b32.xlu1 %v2317_v40, %s3715_s19  ;;  %v3538_v40 = vpack.c.bf16 %v2619_v39, %v2618_v37 }
0x27d1   :  { %v2320_v41 = vpop.permute.xlu1 %2319 }
0x27d2   :  { %v2322_v43 = vadd.f32 %v2320_v41, %v1437_v32  ;;  %v3532_v32 = vpack.c.bf16 %v2537_v31, %v2536_v29  ;;  %v2621_v41 = vld [vmem:[%s4398_s13 + $0x18] sm:$0xff] }
0x27d4   :  { %3656 = vtanh.f32 %v2322_v43 }
0x27de   :  { %v3657_v44 = vpop.eup %3656 }
0x27df   :  { %2326 = vrot.lane.b32.xlu0 %v3657_v44, %s3716_s4  ;;  %v2622_v44 = vld [vmem:[%s4398_s13 + $0x20] sm:$0xff] }
0x2851   :  { %v2327_v45 = vpop.permute.xlu0 %2326 }
0x2852   :  { %v2329_v47 = vmul.f32 %v2327_v45, %v2324_v38  ;;  %v2623_v38 = vld [vmem:[%s4398_s13 + $0x28] sm:$0xff] }
0x2853   :  { %v3544_v45 = vpack.c.bf16 %v2623_v38, %v2622_v44 }
0x2854   :  { %v2331_v51 = vadd.f32 %v2330_v42, %v2329_v47  ;;  %v2624_v42 = vld [vmem:[%s4398_s13 + $0x30] sm:$0xff]  ;;  %v2625_v47 = vld [vmem:[%s4398_s13 + $0x38] sm:$0xff] }
0x2856   :  { %2333 = vrot.lane.b32.xlu1 %v2331_v51, %s3716_s4 }
0x28c8   :  { %v2334_v48 = vpop.permute.xlu1 %2333 }
0x28c9   :  { %3256 = vmatmul.mubr.msk.f32.vlgmr.msra.gmra.mrb[26].mxu1 %vm193_vm3, %v2334_v48  ;;  %v2626_v48 = vld [vmem:[%s4398_s13 + $0x40] sm:$0xff] }
0x28ca   :  { %3301 = vmatprep.mubr.msk.f32.mxu1 %vm3713_vm0, %v3714_v8  ;;  %3515 = vmatpush3.bf16.msra.mxu1 %v3514_v7 }
0x28cb   :  { %3516 = vmatprep.subr.bf16.mxu1 %v3712_v3 }
0x28ce   :  { %3518 = vmatpush3.bf16.msra.mxu1 %v3517_v11 }
0x28cf   :  { %3519 = vmatprep.subr.bf16.mxu1 %v3712_v3 }
0x28d2   :  { %3521 = vmatpush3.bf16.msra.mxu1 %v3520_v17 }
0x28d3   :  { %3522 = vmatprep.subr.bf16.mxu1 %v3712_v3 }
0x28d6   :  { %3524 = vmatpush3.bf16.msra.mxu1 %v3523_v15 }
0x28d7   :  { %3525 = vmatprep.subr.bf16.mxu1 %v3712_v3 }
0x28da   :  { %3527 = vmatpush3.bf16.msra.mxu1 %v3526_v24 }
0x28db   :  { %3528 = vmatprep.subr.bf16.mxu1 %v3712_v3 }
0x28de   :  { %3530 = vmatpush3.bf16.msra.mxu1 %v3529_v28 }
0x28df   :  { %3531 = vmatprep.subr.bf16.mxu1 %v3712_v3 }
0x28e2   :  { %3533 = vmatpush3.bf16.msra.mxu1 %v3532_v32 }
0x28e3   :  { %3534 = vmatprep.subr.bf16.mxu1 %v3712_v3 }
0x28e6   :  { %3536 = vmatpush3.bf16.msra.mxu1 %v3535_v61 }
0x299c   :  { %v2403_v49 = vpop.f32.mrb[26].mxu1 }
0x299d   :  { %v2414_v50 = vadd.f32 %v2403_v49, %v4119_v9  ;;  %v3257_v52 = vpop.f32.mrb[27].mxu1  ;;  %v2407_v53 = vadd.f32 %v2403_v49, %v1616_v54  ;;  %v2440_v9 = vld [vmem:[%s4394_s9] sm:$0xff]  ;;  %v2627_v49 = vld [vmem:[%s4398_s13 + $0x48] sm:$0xff] }
0x299e   :  { %v3508_v0 = vpack.c.bf16 %v2441_v16, %v2440_v9  ;;  %v2628_v52 = vld [vmem:[%s4398_s13 + $0x50] sm:$0xff]  ;;  %v2633_v16 = vld [vmem:[%s4398_s13 + $0x78] sm:$0xff] }
0x299f   :  { %2416 = vrot.lane.b32.xlu0 %v2414_v50, %s3715_s19  ;;  %v2786_v55 = vmul.f32 -1.442695, %v2407_v53  ;;  %v3550_v50 = vpack.c.bf16 %v2627_v49, %v2626_v48  ;;  %v2632_v9 = vld [vmem:[%s4398_s13 + $0x70] sm:$0xff] }
0x29a0   :  { %3509 = vmatpush3.bf16.msra.mxu0 %v3508_v0  ;;  %v3559_v21 = vpack.c.bf16 %v2633_v16, %v2632_v9 }
0x29a1   :  { %3658 = vpow2.f32 %v2786_v55  ;;  %3510 = vmatprep.subr.bf16.mxu0 %v3712_v3  ;;  %v2630_v55 = vld [vmem:[%s4398_s13 + $0x60] sm:$0xff] }
0x29a4   :  { %3512 = vmatpush3.bf16.msra.mxu0 %v3511_v46 }
0x29a5   :  { %3537 = vmatprep.subr.bf16.mxu0 %v3712_v3 }
0x29ab   :  { %v3659_v57 = vpop.eup %3658 }
0x29ac   :  { %v2411_v58 = vadd.f32 1.0, %v3659_v57  ;;  %v2631_v57 = vld [vmem:[%s4398_s13 + $0x68] sm:$0xff] }
0x29ae   :  { %3660 = vrcp.f32 %v2411_v58  ;;  %v3556_v58 = vpack.c.bf16 %v2631_v57, %v2630_v55 }
0x29b8   :  { %v3661_v30 = vpop.eup %3660 }
0x29b9   :  { %v2426_v13 = vsub.f32 1.0, %v3661_v30  ;;  %v2432_v20 = vmul.f32 %v3661_v30, %v2331_v51  ;;  %v3547_v51 = vpack.c.bf16 %v2625_v47, %v2624_v42 }
0x2a11   :  { %v2417_v26 = vpop.permute.xlu0 %2416 }
0x2a12   :  { %v2419_v59 = vmul.f32 %v3661_v30, %v2417_v26  ;;  %v2787_v30 = vld [vmem:[%s4395_s10] ss:$0 sm:$0xff]  ;;  %s3717_s10 = smov [#allocation4]  }
0x2a13   :  { %s2729_s17 = sshll.u32 %s3717_s10, 4  ;;  %s2730_s17 = int_to_ptr.vmem [resolvable:$true] %s2729_s17 }
0x2a14   :  { %2421 = vrot.lane.b32.xlu1 %v2419_v59, %s3715_s19  ;;  %s3664_s18 = scalar_lea.vmem %s2730_s17, 32  ;;  %p3669_p1 = scmp.lt.s32.totalorder %s2730_s17, %s2730_s17 }
0x2a15   :  { %p3665_p0 = scmp.ne.s32.totalorder %s2730_s17, %s3664_s18  ;;  %p3670_p2 = scmp.lt.s32.totalorder %s3664_s18, %s3664_s18 }
0x2a17   :  { %p3671_p3 = por %p3670_p2, %p3669_p1 }
0x2a19   :  { %p3672_p4 = pnand %p3671_p3, %p3665_p0 }
0x2a86   :  { %v2422_v60 = vpop.permute.xlu1 %2421 }
0x2a87   :  { %v2424_v62 = vadd.f32 %v2422_v60, %v1616_v54  ;;  %v2629_v54 = vld [vmem:[%s4398_s13 + $0x58] sm:$0xff] }
0x2a88   :  { %v3553_v53 = vpack.c.bf16 %v2629_v54, %v2628_v52 }
0x2a89   :  { %3662 = vtanh.f32 %v2424_v62 }
0x2a93   :  { %v3663_v2 = vpop.eup %3662 }
0x2a94   :  { %2428 = vrot.lane.b32.xlu0 %v3663_v2, %s3716_s4 }
0x2b06   :  { %v2429_v18 = vpop.permute.xlu0 %2428 }
0x2b07   :  { %v2431_v22 = vmul.f32 %v2429_v18, %v2426_v13 }
0x2b09   :  { %v2433_v56 = vadd.f32 %v2432_v20, %v2431_v22 }
0x2b0b   :  { %2435 = vrot.lane.b32.xlu1 %v2433_v56, %s3716_s4 }
0x2b7d   :  { %v2436_v33 = vpop.permute.xlu1 %2435 }
0x2b7e   :  { %2439 = vst.msk [vmem:[#allocation4] sm:$0x3] %vm2438_vm4, %v2436_v33  ;;  %3267 = vmatmul.mubr.msk.f32.vlgmr.msra.gmra.mrb[22].mxu0 %vm193_vm3, %v2436_v33 }
0x2b7f   :  { %3336 = vmatprep.mubr.msk.f32.mxu0 %vm3713_vm0, %v3714_v8  ;;  %v2620_v8 = vld [vmem:[%s4398_s13 + $0x10] sm:$0xff]  ;;  %3539 = vmatpush3.bf16.msra.mxu0 %v3538_v40 }
0x2b80   :  { %v3541_v43 = vpack.c.bf16 %v2621_v41, %v2620_v8  ;;  %3540 = vmatprep.subr.bf16.mxu0 %v3712_v3 }
0x2b83   :  { %3542 = vmatpush3.bf16.msra.mxu0 %v3541_v43 }
0x2b84   :  { %3543 = vmatprep.subr.bf16.mxu0 %v3712_v3 }
0x2b87   :  { %3545 = vmatpush3.bf16.msra.mxu0 %v3544_v45 }
0x2b88   :  { %3546 = vmatprep.subr.bf16.mxu0 %v3712_v3 }
0x2b8b   :  { %3548 = vmatpush3.bf16.msra.mxu0 %v3547_v51 }
0x2b8c   :  { %3549 = vmatprep.subr.bf16.mxu0 %v3712_v3 }
0x2b8f   :  { %3551 = vmatpush3.bf16.msra.mxu0 %v3550_v50 }
0x2b90   :  { %3552 = vmatprep.subr.bf16.mxu0 %v3712_v3 }
0x2b93   :  { %3554 = vmatpush3.bf16.msra.mxu0 %v3553_v53 }
0x2b94   :  { %3555 = vmatprep.subr.bf16.mxu0 %v3712_v3 }
0x2b97   :  { %3557 = vmatpush3.bf16.msra.mxu0 %v3556_v58 }
0x2b98   :  { %3558 = vmatprep.subr.bf16.mxu0 %v3712_v3  ;;  %v2789_v3 = vld [vmem:[%s4397_s12] ss:$0 sm:$0xff] }
0x2b9b   :  { %3560 = vmatpush3.bf16.msra.mxu0 %v3559_v21 }
0x2c51   :  { %v2519_v26 = vpop.f32.mrb[22].mxu0 }
0x2c52   :  { %v2520_v59 = vadd.f32 %v2787_v30, %v2519_v26  ;;  %v3268_v60 = vpop.f32.mrb[23].mxu0 }
0x2c54   :  { %v2523_v62 = vmax.f32 %v2520_v59, 0.0 }
0x2c56   :  { %3302 = vmatmul.mubr.f32.vlgmr.msra.gmra.mrb[28].mxu1 %v2523_v62 }
0x2d29   :  { %v2613_v0 = vpop.f32.mrb[28].mxu1 }
0x2d2a   :  { %v2614_v1 = vadd.f32 %v2789_v3, %v2613_v0  ;;  %v3303_v46 = vpop.f32.mrb[29].mxu1 }
0x2d2c   :  { %v2617_v2 = vmax.f32 %v2614_v1, 0.0 }
0x2d2e   :  { %3337 = vmatmul.mubr.f32.vlgmr.msra.gmra.mrb[24].mxu0 %v2617_v2 }
0x2d2f   :  { %3675 = shalt.err (!%p3672_p4)
}
0x2d30   :  { %s3676_s21 = scalar_lea.hbm %s4401_s16, 32 }
0x2d31   :  { %p3677_p5 = scmp.ne.s32.totalorder %s4401_s16, %s3676_s21  ;;  %p3680_p6 = scmp.lt.u32.totalorder %s3676_s21, %s4401_s16 }
0x2d33   :  { %p3682_p7 = pnand %p3680_p6, %p3677_p5 }
0x2d35   :  { %3685 = shalt.err (!%p3682_p7)
}
0x2d36   :  { %2732 = dma.vmem_to_hbm [thread:$0]  %s2730_s17, 32, %s4401_s16, [#allocation5]   ;;  %v2790_v4 = vld [vmem:[%s4399_s14] ss:$0 sm:$0xff]  ;;  %vm2711_vm5 = vcmask 17408  }
0x2d37   :  { %s3718_s9 = smov [#allocation2]  }
0x2d38   :  { %s2719_s2 = sshll.u32 %s3718_s9, 4  ;;  %s2720_s2 = int_to_ptr.vmem [resolvable:$true] %s2719_s2 }
0x2d39   :  { %s3686_s26 = scalar_lea.vmem %s2720_s2, 32  ;;  %p3691_p9 = scmp.lt.s32.totalorder %s2720_s2, %s2720_s2 }
0x2d3a   :  { %p3687_p8 = scmp.ne.s32.totalorder %s2720_s2, %s3686_s26  ;;  %p3692_p10 = scmp.lt.s32.totalorder %s3686_s26, %s3686_s26 }
0x2d3c   :  { %p3693_p11 = por %p3692_p10, %p3691_p9 }
0x2d3e   :  { %p3694_p12 = pnand %p3693_p11, %p3687_p8 }
0x2e01   :  { %v2707_v5 = vpop.f32.mrb[24].mxu0 }
0x2e02   :  { %v2708_v6 = vadd.f32 %v2790_v4, %v2707_v5  ;;  %v3338_v7 = vpop.f32.mrb[25].mxu0 }
0x2e04   :  { %2712 = vst.msk [vmem:[#allocation2] sm:$0x3] %vm2711_vm5, %v2708_v6 }
0x2e05   :  { %3697 = shalt.err (!%p3694_p12)
}
0x2e06   :  { %s3698_s28 = scalar_lea.hbm %s4400_s15, 32 }
0x2e07   :  { %p3699_p13 = scmp.ne.s32.totalorder %s4400_s15, %s3698_s28  ;;  %p3702_p0 = scmp.lt.u32.totalorder %s3698_s28, %s4400_s15 }
0x2e09   :  { %p3704_p1 = pnand %p3702_p0, %p3699_p13 }
0x2e0b   :  { %3707 = shalt.err (!%p3704_p1)
}
0x2e0c   :  { %2722 = dma.vmem_to_hbm [thread:$0]  %s2720_s2, 32, %s4400_s15, [#allocation3]  }
0x2e0d   :  { %3708 = dma.done.wait [#allocation3], 32  }
0x2e0e   :  { %3709 = vsyncadd [#allocation3], 4294967264 }
0x2e0f   :  { %3710 = dma.done.wait [#allocation5], 32  }
0x2e10   :  { %3711 = vsyncadd [#allocation5], 4294967264 }
0x2e11   :  { %2739 = vsyncpa [#allocation3], 1 }
0x2e12   :  { %2740 = vsyncpa [#allocation5], 1 }

</bundles_post_ra>
